<compile_context>
chip_gen: v7x
topology: tpu7x:2x2x1
jax: 0.10.0
libtpu: 0.0.40
codegen_flags: <defaults>
</compile_context>

<pallas_src>
import jax
import jax.numpy as jnp
from jax.experimental import pallas as pl
from jax.experimental.pallas import tpu as pltpu


def _default_ncores():
    """Use 2 grid-parallel shards only on chips with 2 TensorCores (megacore)."""
    try:
        kind = jax.devices()[0].device_kind.lower()
    except Exception:
        return 1
    return 2 if any(t in kind for t in ("v4", "v5p", "v7", "7x")) else 1


def _vmem_limit_bytes():
    """Scoped-VMEM limit: ~3/4 of physical per-core VMEM, capped, v7x-safe fallback."""
    try:
        cap = int(pltpu.get_tpu_info().vmem_capacity_bytes)
    except Exception:
        cap = 64 * 1024 * 1024          # v7x per-TC size (conservative fallback)
    return max(32 * 1024 * 1024, min(cap * 3 // 4, 112 * 1024 * 1024))


def _make_kernel(wp, l_blk, q_out):
    """wp = padded row stride, l_blk = lane-aligned per-side (x or y) block stride,
    q_out = output positions per block (includes masked pad columns)."""
    taps = [kh * wp + kw for kh in range(3) for kw in range(3)]
    width = l_blk + q_out               # one RHS slice covers x taps AND y taps

    def kernel(w_ref, b_ref, m_ref, xy_ref, loss_ref, acc_ref):
        j = pl.program_id(1)

        @pl.when(j == 0)
        def _init():
            acc_ref[...] = jnp.zeros_like(acc_ref)
            loss_ref[...] = jnp.zeros_like(loss_ref)

        xy = xy_ref[0]                  # (Cin, 2*l_blk) bf16: [ x images | y images ]

        # 9 accumulating per-tap matmuls; each constant lane shift feeds the MXU
        # directly (no (9*Cin, P) im2col concat / VMEM round-trip).
        f = None
        for t, s in enumerate(taps):
            rhs = xy[:, s:s + width]    # x taps land in [0,q_out), y taps in [l_blk, l_blk+q_out)
            p = jnp.dot(w_ref[t], rhs, preferred_element_type=jnp.float32)
            f = p if f is None else f + p

        b = b_ref[...]                                    # (Cout, 1) f32
        fx = jnp.maximum(f[:, :q_out] + b, 0.0)           # fea_x = network(x)
        fy = jnp.maximum(f[:, l_blk:l_blk + q_out] + b, 0.0)   # fea_y = network(y).detach()

        d = (fx - fy) * m_ref[...]      # mask pad/garbage columns BEFORE squaring
        acc_ref[...] += d * d           # full-width f32 vector accumulator (VPU only)

        @pl.when(j == pl.num_programs(1) - 1)
        def _fin():
            loss_ref[...] = jnp.sum(acc_ref[...]).reshape(1, 1, 1)

    return kernel


def perceptual_loss(x, y, weight, bias, *, images_per_step=None, ncores=None):
    """x, y: [N, C, H, W] f32; weight: [Cout, Cin, 3, 3]; bias: [Cout].
    Returns scalar MSE between conv+ReLU features of x and y (PerceptualLoss forward)."""
    n, c, h, w = x.shape
    cout = weight.shape[0]
    wp = w + 2                          # padded row stride (1 left + 1 right pad col)
    l_img = (h + 2) * wp                # exact SAME-padded image, flattened

    if ncores is None:
        ncores = _default_ncores()
    ncores = max(1, min(ncores, n))
    per_core = -(-n // ncores)

    if images_per_step is None:
        # Per-step working-set budget (input block double-buffered + f32 accumulator),
        # sized so even v7x's 64 MiB/TC has ample headroom.
        budget = 8 * 1024 * 1024
        per_img = l_img * 4 * (2 * c + cout)
        images_per_step = int(max(1, min(per_core, budget // max(per_img, 1), 256)))
    B = images_per_step
    spc = -(-per_core // B)             # grid steps per core
    n_pad = ncores * spc * B            # zero-padded dummy images contribute exactly 0
    nblocks = ncores * spc

    q_out = (B - 1) * l_img + h * wp    # output positions per block (incl. masked cols)
    l_blk = -(-(B * l_img + 2) // 128) * 128   # lane-aligned per-side stride (x or y)

    def pack(img):
        img = jnp.pad(img, ((0, n_pad - n), (0, 0), (1, 1), (1, 1)))
        flat = img.reshape(n_pad, c, l_img)
        blk = flat.reshape(nblocks, B, c, l_img).transpose(0, 2, 1, 3)
        blk = blk.reshape(nblocks, c, B * l_img)
        blk = jnp.pad(blk, ((0, 0), (0, 0), (0, l_blk - B * l_img)))
        return blk.astype(jnp.bfloat16)

    # One combined buffer per block: x images in [0, l_blk), y images in [l_blk, 2*l_blk).
    xy = jnp.concatenate([pack(x), pack(y)], axis=-1)       # (nblocks, c, 2*l_blk)

    # torch Conv2d weight [Cout, Cin, kh, kw] -> 9 per-tap (Cout, Cin) matrices,
    # tap index kh*3 + kw matching the in-kernel shift order.
    wtap = jnp.transpose(weight, (2, 3, 0, 1)).reshape(9, cout, c).astype(jnp.bfloat16)
    b2 = bias.reshape(cout, 1).astype(jnp.float32)

    q = jnp.arange(q_out)
    p = q % l_img
    mask = ((p < h * wp) & (p % wp < w)).astype(jnp.float32).reshape(1, q_out)

    kernel = _make_kernel(wp, l_blk, q_out)

    partial = pl.pallas_call(
        kernel,
        grid=(ncores, spc),
        in_specs=[
            pl.BlockSpec((9, cout, c), lambda i, j: (0, 0, 0)),           # weights (resident)
            pl.BlockSpec((cout, 1), lambda i, j: (0, 0)),                 # bias    (resident)
            pl.BlockSpec((1, q_out), lambda i, j: (0, 0)),                # mask    (resident)
            pl.BlockSpec((1, c, 2 * l_blk),
                         lambda i, j, spc=spc: (i * spc + j, 0, 0)),      # x|y block
        ],
        out_specs=pl.BlockSpec((1, 1, 1), lambda i, j: (i, 0, 0)),        # per-core partial
        out_shape=jax.ShapeDtypeStruct((ncores, 1, 1), jnp.float32),
        scratch_shapes=[pltpu.VMEM((cout, q_out), jnp.float32)],          # f32 accumulator
        compiler_params=pltpu.CompilerParams(
            dimension_semantics=("parallel", "arbitrary"),
            vmem_limit_bytes=_vmem_limit_bytes(),
        ),
    )(wtap, b2, mask, xy)

    total = n * cout * h * w            # TOTAL feature element count (MSE = mean)
    return jnp.sum(partial) / total


def _reference(x, y, weight, bias):
    """Pure-JAX reference of the same forward (conv+ReLU features, MSE criterion),
    using the same bf16 input/weight quantization as the kernel."""
    xb = x.astype(jnp.bfloat16).astype(jnp.float32)
    yb = y.astype(jnp.bfloat16).astype(jnp.float32)
    wb = weight.astype(jnp.bfloat16).astype(jnp.float32)
    dn = ("NCHW", "OIHW", "NCHW")
    fx = jax.lax.conv_general_dilated(xb, wb, (1, 1), "SAME", dimension_numbers=dn,
                                      precision=jax.lax.Precision.HIGHEST)
    fy = jax.lax.conv_general_dilated(yb, wb, (1, 1), "SAME", dimension_numbers=dn,
                                      precision=jax.lax.Precision.HIGHEST)
    fx = jnp.maximum(fx + bias[None, :, None, None], 0.0)
    fy = jnp.maximum(fy + bias[None, :, None, None], 0.0)
    return jnp.mean((fx - fy) ** 2)


if __name__ == "__main__":
    key = jax.random.PRNGKey(0)
    kx, ky, kw_, kb = jax.random.split(key, 4)

    N, C, H, W, COUT = 2, 4, 16, 16, 8
    x = jax.random.normal(kx, (N, C, H, W), dtype=jnp.float32)
    y = jax.random.normal(ky, (N, C, H, W), dtype=jnp.float32)
    # Deterministic "network" params (kaiming-ish scale for a 3x3 conv).
    weight = jax.random.normal(kw_, (COUT, C, 3, 3), dtype=jnp.float32) / jnp.sqrt(C * 9.0)
    bias = 0.1 * jax.random.normal(kb, (COUT,), dtype=jnp.float32)

    loss = jax.block_until_ready(perceptual_loss(x, y, weight, bias))
    ref = jax.block_until_ready(_reference(x, y, weight, bias))
    assert jnp.allclose(loss, ref, rtol=2e-3, atol=1e-6), (loss, ref)
    print("KERNEL_OK")
</pallas_src>

<mosaic_0001>
module attributes {stable_mosaic.version = 11 : i64} {
  func.func @kernel(%arg0: i32, %arg1: i32, %arg2: memref<9x8x4xbf16, #tpu.memory_space<vmem>>, %arg3: memref<8x1xf32, #tpu.memory_space<vmem>>, %arg4: memref<1x612xf32, #tpu.memory_space<vmem>>, %arg5: memref<1x4x1536xbf16, #tpu.memory_space<vmem>>, %arg6: memref<1x1x1xf32, #tpu.memory_space<vmem>>, %arg7: memref<8x612xf32, #tpu.memory_space<vmem>>) attributes {dimension_semantics = [#tpu.dimension_semantics<parallel>, #tpu.dimension_semantics<arbitrary>], iteration_bounds = array<i64: 1, 1>, scalar_prefetch = 0 : i64, scratch_operands = 1 : i64, tpu.core_type = #tpu.core_type<tc>, window_params = [{pipeline_mode = #tpu.pipeline_mode<synchronous>, transform_indices = @transform_0, window_bounds = array<i64: 9, 8, 4>}, {pipeline_mode = #tpu.pipeline_mode<synchronous>, transform_indices = @transform_1, window_bounds = array<i64: 8, 1>}, {pipeline_mode = #tpu.pipeline_mode<synchronous>, transform_indices = @transform_2, window_bounds = array<i64: 1, 612>}, {transform_indices = @transform_3, window_bounds = array<i64: 1, 4, 1536>}, {transform_indices = @transform_4, window_bounds = array<i64: 1, 1, 1>}]} {
    %c0_i32 = arith.constant 0 : i32
    %0 = arith.cmpi eq, %arg1, %c0_i32 : i32
    %1 = arith.extui %0 : i1 to i32
    %c0_i32_0 = arith.constant 0 : i32
    %2 = arith.cmpi ne, %1, %c0_i32_0 : i32
    scf.if %2 {
      %cst_42 = arith.constant 0.000000e+00 : f32
      %71 = vector.broadcast %cst_42 : f32 to vector<8x612xf32>
      %c0_43 = arith.constant 0 : index
      %c0_44 = arith.constant 0 : index
      %72 = vector.load %arg7[%c0_43, %c0_44] : memref<8x612xf32, #tpu.memory_space<vmem>>, vector<8x612xf32>
      tpu.vector_store %arg7[%c0_43, %c0_44], %71 {strides = array<i32>} : memref<8x612xf32, #tpu.memory_space<vmem>>, vector<8x612xf32>,
      %cst_45 = arith.constant 0.000000e+00 : f32
      %73 = vector.broadcast %cst_45 : f32 to vector<1x1x1xf32>
      %c0_46 = arith.constant 0 : index
      %c0_47 = arith.constant 0 : index
      %c0_48 = arith.constant 0 : index
      %74 = vector.load %arg6[%c0_46, %c0_47, %c0_48] : memref<1x1x1xf32, #tpu.memory_space<vmem>>, vector<1x1x1xf32>
      tpu.vector_store %arg6[%c0_46, %c0_47, %c0_48], %73 {strides = array<i32>} : memref<1x1x1xf32, #tpu.memory_space<vmem>>, vector<1x1x1xf32>,
    } else {
    }
    %c0 = arith.constant 0 : index
    %c0_1 = arith.constant 0 : index
    %c0_2 = arith.constant 0 : index
    %3 = vector.load %arg5[%c0, %c0_1, %c0_2] : memref<1x4x1536xbf16, #tpu.memory_space<vmem>>, vector<1x4x1536xbf16>
    %4 = vector.shape_cast %3 : vector<1x4x1536xbf16> to vector<4x1536xbf16>
    %5 = vector.extract_strided_slice %4 {offsets = [0, 0], sizes = [4, 1380], strides = [1, 1]} : vector<4x1536xbf16> to vector<4x1380xbf16>
    %c0_3 = arith.constant 0 : index
    %c0_4 = arith.constant 0 : index
    %c0_5 = arith.constant 0 : index
    %6 = vector.load %arg2[%c0_3, %c0_4, %c0_5] : memref<9x8x4xbf16, #tpu.memory_space<vmem>>, vector<1x8x4xbf16>
    %7 = vector.shape_cast %6 : vector<1x8x4xbf16> to vector<8x4xbf16>
    %cst = arith.constant dense<0.000000e+00> : vector<8x1380xf32>
    %8 = tpu.matmul %7, %5, %cst {dimension_numbers = #tpu.dot_dimension_numbers<[1], [0], [0], [1], [0, 0, 1, 1], [], []>} : vector<8x4xbf16>, vector<4x1380xbf16>, vector<8x1380xf32> -> vector<8x1380xf32>
    %9 = vector.extract_strided_slice %4 {offsets = [0, 1], sizes = [4, 1380], strides = [1, 1]} : vector<4x1536xbf16> to vector<4x1380xbf16>
    %c1 = arith.constant 1 : index
    %c0_6 = arith.constant 0 : index
    %c0_7 = arith.constant 0 : index
    %10 = vector.load %arg2[%c1, %c0_6, %c0_7] : memref<9x8x4xbf16, #tpu.memory_space<vmem>>, vector<1x8x4xbf16>
    %11 = vector.shape_cast %10 : vector<1x8x4xbf16> to vector<8x4xbf16>
    %cst_8 = arith.constant dense<0.000000e+00> : vector<8x1380xf32>
    %12 = tpu.matmul %11, %9, %cst_8 {dimension_numbers = #tpu.dot_dimension_numbers<[1], [0], [0], [1], [0, 0, 1, 1], [], []>} : vector<8x4xbf16>, vector<4x1380xbf16>, vector<8x1380xf32> -> vector<8x1380xf32>
    %13 = arith.addf %8, %12 : vector<8x1380xf32>
    %14 = vector.extract_strided_slice %4 {offsets = [0, 2], sizes = [4, 1380], strides = [1, 1]} : vector<4x1536xbf16> to vector<4x1380xbf16>
    %c2 = arith.constant 2 : index
    %c0_9 = arith.constant 0 : index
    %c0_10 = arith.constant 0 : index
    %15 = vector.load %arg2[%c2, %c0_9, %c0_10] : memref<9x8x4xbf16, #tpu.memory_space<vmem>>, vector<1x8x4xbf16>
    %16 = vector.shape_cast %15 : vector<1x8x4xbf16> to vector<8x4xbf16>
    %cst_11 = arith.constant dense<0.000000e+00> : vector<8x1380xf32>
    %17 = tpu.matmul %16, %14, %cst_11 {dimension_numbers = #tpu.dot_dimension_numbers<[1], [0], [0], [1], [0, 0, 1, 1], [], []>} : vector<8x4xbf16>, vector<4x1380xbf16>, vector<8x1380xf32> -> vector<8x1380xf32>
    %18 = arith.addf %13, %17 : vector<8x1380xf32>
    %19 = vector.extract_strided_slice %4 {offsets = [0, 18], sizes = [4, 1380], strides = [1, 1]} : vector<4x1536xbf16> to vector<4x1380xbf16>
    %c3 = arith.constant 3 : index
    %c0_12 = arith.constant 0 : index
    %c0_13 = arith.constant 0 : index
    %20 = vector.load %arg2[%c3, %c0_12, %c0_13] : memref<9x8x4xbf16, #tpu.memory_space<vmem>>, vector<1x8x4xbf16>
    %21 = vector.shape_cast %20 : vector<1x8x4xbf16> to vector<8x4xbf16>
    %cst_14 = arith.constant dense<0.000000e+00> : vector<8x1380xf32>
    %22 = tpu.matmul %21, %19, %cst_14 {dimension_numbers = #tpu.dot_dimension_numbers<[1], [0], [0], [1], [0, 0, 1, 1], [], []>} : vector<8x4xbf16>, vector<4x1380xbf16>, vector<8x1380xf32> -> vector<8x1380xf32>
    %23 = arith.addf %18, %22 : vector<8x1380xf32>
    %24 = vector.extract_strided_slice %4 {offsets = [0, 19], sizes = [4, 1380], strides = [1, 1]} : vector<4x1536xbf16> to vector<4x1380xbf16>
    %c4 = arith.constant 4 : index
    %c0_15 = arith.constant 0 : index
    %c0_16 = arith.constant 0 : index
    %25 = vector.load %arg2[%c4, %c0_15, %c0_16] : memref<9x8x4xbf16, #tpu.memory_space<vmem>>, vector<1x8x4xbf16>
    %26 = vector.shape_cast %25 : vector<1x8x4xbf16> to vector<8x4xbf16>
    %cst_17 = arith.constant dense<0.000000e+00> : vector<8x1380xf32>
    %27 = tpu.matmul %26, %24, %cst_17 {dimension_numbers = #tpu.dot_dimension_numbers<[1], [0], [0], [1], [0, 0, 1, 1], [], []>} : vector<8x4xbf16>, vector<4x1380xbf16>, vector<8x1380xf32> -> vector<8x1380xf32>
    %28 = arith.addf %23, %27 : vector<8x1380xf32>
    %29 = vector.extract_strided_slice %4 {offsets = [0, 20], sizes = [4, 1380], strides = [1, 1]} : vector<4x1536xbf16> to vector<4x1380xbf16>
    %c5 = arith.constant 5 : index
    %c0_18 = arith.constant 0 : index
    %c0_19 = arith.constant 0 : index
    %30 = vector.load %arg2[%c5, %c0_18, %c0_19] : memref<9x8x4xbf16, #tpu.memory_space<vmem>>, vector<1x8x4xbf16>
    %31 = vector.shape_cast %30 : vector<1x8x4xbf16> to vector<8x4xbf16>
    %cst_20 = arith.constant dense<0.000000e+00> : vector<8x1380xf32>
    %32 = tpu.matmul %31, %29, %cst_20 {dimension_numbers = #tpu.dot_dimension_numbers<[1], [0], [0], [1], [0, 0, 1, 1], [], []>} : vector<8x4xbf16>, vector<4x1380xbf16>, vector<8x1380xf32> -> vector<8x1380xf32>
    %33 = arith.addf %28, %32 : vector<8x1380xf32>
    %34 = vector.extract_strided_slice %4 {offsets = [0, 36], sizes = [4, 1380], strides = [1, 1]} : vector<4x1536xbf16> to vector<4x1380xbf16>
    %c6 = arith.constant 6 : index
    %c0_21 = arith.constant 0 : index
    %c0_22 = arith.constant 0 : index
    %35 = vector.load %arg2[%c6, %c0_21, %c0_22] : memref<9x8x4xbf16, #tpu.memory_space<vmem>>, vector<1x8x4xbf16>
    %36 = vector.shape_cast %35 : vector<1x8x4xbf16> to vector<8x4xbf16>
    %cst_23 = arith.constant dense<0.000000e+00> : vector<8x1380xf32>
    %37 = tpu.matmul %36, %34, %cst_23 {dimension_numbers = #tpu.dot_dimension_numbers<[1], [0], [0], [1], [0, 0, 1, 1], [], []>} : vector<8x4xbf16>, vector<4x1380xbf16>, vector<8x1380xf32> -> vector<8x1380xf32>
    %38 = arith.addf %33, %37 : vector<8x1380xf32>
    %39 = vector.extract_strided_slice %4 {offsets = [0, 37], sizes = [4, 1380], strides = [1, 1]} : vector<4x1536xbf16> to vector<4x1380xbf16>
    %c7 = arith.constant 7 : index
    %c0_24 = arith.constant 0 : index
    %c0_25 = arith.constant 0 : index
    %40 = vector.load %arg2[%c7, %c0_24, %c0_25] : memref<9x8x4xbf16, #tpu.memory_space<vmem>>, vector<1x8x4xbf16>
    %41 = vector.shape_cast %40 : vector<1x8x4xbf16> to vector<8x4xbf16>
    %cst_26 = arith.constant dense<0.000000e+00> : vector<8x1380xf32>
    %42 = tpu.matmul %41, %39, %cst_26 {dimension_numbers = #tpu.dot_dimension_numbers<[1], [0], [0], [1], [0, 0, 1, 1], [], []>} : vector<8x4xbf16>, vector<4x1380xbf16>, vector<8x1380xf32> -> vector<8x1380xf32>
    %43 = arith.addf %38, %42 : vector<8x1380xf32>
    %44 = vector.extract_strided_slice %4 {offsets = [0, 38], sizes = [4, 1380], strides = [1, 1]} : vector<4x1536xbf16> to vector<4x1380xbf16>
    %c8 = arith.constant 8 : index
    %c0_27 = arith.constant 0 : index
    %c0_28 = arith.constant 0 : index
    %45 = vector.load %arg2[%c8, %c0_27, %c0_28] : memref<9x8x4xbf16, #tpu.memory_space<vmem>>, vector<1x8x4xbf16>
    %46 = vector.shape_cast %45 : vector<1x8x4xbf16> to vector<8x4xbf16>
    %cst_29 = arith.constant dense<0.000000e+00> : vector<8x1380xf32>
    %47 = tpu.matmul %46, %44, %cst_29 {dimension_numbers = #tpu.dot_dimension_numbers<[1], [0], [0], [1], [0, 0, 1, 1], [], []>} : vector<8x4xbf16>, vector<4x1380xbf16>, vector<8x1380xf32> -> vector<8x1380xf32>
    %48 = arith.addf %43, %47 : vector<8x1380xf32>
    %c0_30 = arith.constant 0 : index
    %c0_31 = arith.constant 0 : index
    %49 = vector.load %arg3[%c0_30, %c0_31] : memref<8x1xf32, #tpu.memory_space<vmem>>, vector<8x1xf32>
    %50 = vector.extract_strided_slice %48 {offsets = [0, 0], sizes = [8, 612], strides = [1, 1]} : vector<8x1380xf32> to vector<8x612xf32>
    %51 = vector.broadcast %49 : vector<8x1xf32> to vector<8x612xf32>
    %52 = arith.addf %50, %51 : vector<8x612xf32>
    %cst_32 = arith.constant 0.000000e+00 : f32
    %53 = vector.broadcast %cst_32 : f32 to vector<8x612xf32>
    %54 = arith.maximumf %52, %53 : vector<8x612xf32>
    %55 = vector.extract_strided_slice %48 {offsets = [0, 768], sizes = [8, 612], strides = [1, 1]} : vector<8x1380xf32> to vector<8x612xf32>
    %56 = vector.broadcast %49 : vector<8x1xf32> to vector<8x612xf32>
    %57 = arith.addf %55, %56 : vector<8x612xf32>
    %cst_33 = arith.constant 0.000000e+00 : f32
    %58 = vector.broadcast %cst_33 : f32 to vector<8x612xf32>
    %59 = arith.maximumf %57, %58 : vector<8x612xf32>
    %60 = arith.subf %54, %59 : vector<8x612xf32>
    %c0_34 = arith.constant 0 : index
    %c0_35 = arith.constant 0 : index
    %61 = vector.load %arg4[%c0_34, %c0_35] : memref<1x612xf32, #tpu.memory_space<vmem>>, vector<1x612xf32>
    %62 = vector.broadcast %61 : vector<1x612xf32> to vector<8x612xf32>
    %63 = arith.mulf %60, %62 : vector<8x612xf32>
    %c0_36 = arith.constant 0 : index
    %c0_37 = arith.constant 0 : index
    %64 = vector.load %arg7[%c0_36, %c0_37] : memref<8x612xf32, #tpu.memory_space<vmem>>, vector<8x612xf32>
    %65 = arith.mulf %63, %63 : vector<8x612xf32>
    %66 = arith.addf %64, %65 : vector<8x612xf32>
    %c0_38 = arith.constant 0 : index
    %c0_39 = arith.constant 0 : index
    %67 = vector.load %arg7[%c0_38, %c0_39] : memref<8x612xf32, #tpu.memory_space<vmem>>, vector<8x612xf32>
    tpu.vector_store %arg7[%c0_38, %c0_39], %66 {strides = array<i32>} : memref<8x612xf32, #tpu.memory_space<vmem>>, vector<8x612xf32>,
    %c0_i32_40 = arith.constant 0 : i32
    %68 = arith.cmpi eq, %arg1, %c0_i32_40 : i32
    %69 = arith.extui %68 : i1 to i32
    %c0_i32_41 = arith.constant 0 : i32
    %70 = arith.cmpi ne, %69, %c0_i32_41 : i32
    scf.if %70 {
      %c0_42 = arith.constant 0 : index
      %c0_43 = arith.constant 0 : index
      %71 = vector.load %arg7[%c0_42, %c0_43] : memref<8x612xf32, #tpu.memory_space<vmem>>, vector<8x612xf32>
      %72 = vector.shape_cast %71 : vector<8x612xf32> to vector<1x8x612xf32>
      %cst_44 = arith.constant dense<0.000000e+00> : vector<1xf32>
      %73 = vector.multi_reduction <add>, %72, %cst_44 [1, 2] : vector<1x8x612xf32> to vector<1xf32>
      %74 = vector.shape_cast %73 : vector<1xf32> to vector<1x1x1xf32>
      %75 = vector.extract %74[0, 0, 0] : f32 from vector<1x1x1xf32>
      %76 = vector.broadcast %75 : f32 to vector<1x1x1xf32>
      %c0_45 = arith.constant 0 : index
      %c0_46 = arith.constant 0 : index
      %c0_47 = arith.constant 0 : index
      %77 = vector.load %arg6[%c0_45, %c0_46, %c0_47] : memref<1x1x1xf32, #tpu.memory_space<vmem>>, vector<1x1x1xf32>
      tpu.vector_store %arg6[%c0_45, %c0_46, %c0_47], %76 {strides = array<i32>} : memref<1x1x1xf32, #tpu.memory_space<vmem>>, vector<1x1x1xf32>,
    } else {
    }
    return
  }
  func.func @transform_0(%arg0: i32, %arg1: i32) -> (i32, i32, i32) {
    %c0_i32 = arith.constant 0 : i32
    %c0_i32_0 = arith.constant 0 : i32
    %c0_i32_1 = arith.constant 0 : i32
    %c0_i32_2 = arith.constant 0 : i32
    return %c0_i32, %c0_i32_0, %c0_i32_1 : i32, i32, i32
  }
  func.func @transform_1(%arg0: i32, %arg1: i32) -> (i32, i32) {
    %c0_i32 = arith.constant 0 : i32
    %c0_i32_0 = arith.constant 0 : i32
    %c0_i32_1 = arith.constant 0 : i32
    return %c0_i32, %c0_i32_0 : i32, i32
  }
  func.func @transform_2(%arg0: i32, %arg1: i32) -> (i32, i32) {
    %c0_i32 = arith.constant 0 : i32
    %c0_i32_0 = arith.constant 0 : i32
    %c0_i32_1 = arith.constant 0 : i32
    return %c0_i32, %c0_i32_0 : i32, i32
  }
  func.func @transform_3(%arg0: i32, %arg1: i32) -> (i32, i32, i32) {
    %c1_i32 = arith.constant 1 : i32
    %0 = arith.muli %arg0, %c1_i32 : i32
    %1 = arith.addi %0, %arg1 : i32
    %c0_i32 = arith.constant 0 : i32
    %c0_i32_0 = arith.constant 0 : i32
    %c0_i32_1 = arith.constant 0 : i32
    return %1, %c0_i32, %c0_i32_0 : i32, i32, i32
  }
  func.func @transform_4(%arg0: i32, %arg1: i32) -> (i32, i32, i32) {
    %c0_i32 = arith.constant 0 : i32
    %c0_i32_0 = arith.constant 0 : i32
    %c0_i32_1 = arith.constant 0 : i32
    return %arg0, %c0_i32, %c0_i32_0 : i32, i32, i32
  }
}

</mosaic_0001>

<bundles_post_ra>
// kernel: tpu_custom_call.1
= control target key start
LH: loop header
LB: loop body
LE: loop exit
PB: predicated region body
PF: predicated region fallthrough
CT: control target
= control target key end

     0   :  { %v64_v1 = vlaneseq  ;;  %v3342_v2 = vmov 1983009808   ;;  %s4101_s0 = inlined_call_operand.vmem [shape: bf16[9,8,4], index: 0, kind: input, shape index: {}]   ;;  %s4102_s1 = inlined_call_operand.vmem [shape: f32[8,1], index: 1, kind: input, shape index: {}]   ;;  %s4103_s2 = inlined_call_operand.vmem [shape: f32[1,612], index: 2, kind: input, shape index: {}]   ;;  %s4104_s3 = inlined_call_operand.vmem [shape: bf16[1,4,1536], index: 3, kind: input, shape index: {}]   ;;  %s4105_s4 = inlined_call_operand.hbm [shape: f32[1,1,1], index: 4, kind: output, shape index: {}]  }
   0x1   :  { %v51_v0 = vld [vmem:[%s4104_s3] sm:$0xff]  ;;  %v62_v3 = vunpack.c.l.s4 %v3342_v2 }
   0x2   :  { %9 = vsyncpa [#allocation4], 0  ;;  %v3383_v4 = vshrl.u32 %v64_v1, 7  ;;  %v60_v6 = vcombine.high %v51_v0, %v51_v0  ;;  %v3343_v7 = vmov 0   ;;  %v52_v9 = vld [vmem:[%s4104_s3 + $0x8] sm:$0xff]  ;;  %s3344_s19 = smov 127  }
   0x3   :  { %v63_v5 = vunpack.c.0.s8 %v62_v3  ;;  %213 = vmatprep.mubr.bf16.mxu0 %v3343_v7  ;;  %254 = vmatprep.mubr.bf16.mxu1 %v3343_v7  ;;  %v77_v12 = vcombine.high %v52_v9, %v52_v9  ;;  %v53_v18 = vld [vmem:[%s4104_s3 + $0x10] sm:$0xff]  ;;  %s3345_s3 = smov 126   ;;  %s3346_s22 = smov 110   ;;  %vm132_vm0 = vcmask 1039360   ;;  %vm147_vm1 = vcmask 1041408  }
   0x4   :  { %3313 = vset.pattern.permute.xlu1 %v3343_v7  ;;  %3314 = vset.pattern.permute.xlu0 %v3343_v7  ;;  %v94_v22 = vcombine.high %v53_v18, %v53_v18  ;;  %s3347_s23 = smov 109   ;;  %s3348_s24 = smov 108   ;;  %v3502_v31 = vld [vmem:[%s4101_s0 + $0x4] sm:$0xf]  ;;  %vm143_vm2 = vcmask 31744   ;;  %v3350_v50 = vmov 0.0  }
   0x5   :  { %v66_v8 = vsub.s32 %v63_v5, %v3383_v4  ;;  %s3349_s25 = smov 92   ;;  %s3351_s28 = smov 91   ;;  %vm3352_vm3 = vmmov 0   ;;  %v54_v61 = vld [vmem:[%s4101_s0] sm:$0xf]  ;;  %vm729_vm4 = vcmask 1031168  }
   0x6   :  { %s3353_s5 = smov 90   ;;  %vm1054_vm5 = vcmask 900096   ;;  %vm1379_vm6 = vcmask 891904   ;;  %vm1704_vm7 = vcmask 883712   ;;  %vm2032_vm8 = vcmask 752640  }
   0x7   :  { %v3393_v10 = vrot.slane %v51_v0, %v66_v8  ;;  %v3395_v11 = vrot.slane %v60_v6, %v66_v8  ;;  %v3407_v15 = vrot.slane %v52_v9, %v66_v8  ;;  %v3415_v17 = vrot.slane %v77_v12, %v66_v8 }
   0x8   :  { %v3426_v20 = vrot.slane %v53_v18, %v66_v8  ;;  %v3436_v23 = vrot.slane %v94_v22, %v66_v8  ;;  %vm2360_vm9 = vcmask 744448   ;;  %vm2688_vm10 = vcmask 736256  }
   0x9   :  { %110 = vrot.lane.b32.xlu0 %v3393_v10, %s3344_s19  ;;  %114 = vrot.lane.b32.xlu1 %v3395_v11, %s3344_s19  ;;  %v3401_v13 = vcombine.high %v3393_v10, %v3393_v10  ;;  %v3405_v14 = vcombine.high %v3395_v11, %v3395_v11  ;;  %v3413_v16 = vcombine.high %v3407_v15, %v3407_v15  ;;  %v429_v55 = vsel %vm147_vm1, %v3393_v10, 0 }
   0xa   :  { %v3424_v19 = vcombine.high %v3415_v17, %v3415_v17  ;;  %v3432_v21 = vcombine.high %v3426_v20, %v3426_v20  ;;  %v3531_v45 = vcombine.high %v3436_v23, %v3436_v23  ;;  %v435_v58 = vsel %vm147_vm1, %v3395_v11, 0 }
   0xb   :  { %v441_v62 = vsel %vm147_vm1, %v3407_v15, 0  ;;  %v447_v1 = vsel %vm147_vm1, %v3415_v17, 0  ;;  %v453_v5 = vsel %vm147_vm1, %v3426_v20, 0  ;;  %v459_v12 = vsel %vm147_vm1, %v3436_v23, 0 }
   0xc   :  { %vm47_vm11 = vcmask 818176   ;;  %vm49_vm12 = vcmask 0  }
   0xd   :  { %112 = vrot.lane.b32.xlu0 %v3401_v13, %s3344_s19  ;;  %116 = vrot.lane.b32.xlu1 %v3405_v14, %s3344_s19  ;;  %48 = vst.msk [vmem:[#allocation2 + $0x20] sm:$0xff] %vm47_vm11, %v3350_v50 }
   0xe   :  { %50 = vst.msk [vmem:[#allocation3] sm:$0x1] %vm49_vm12, %v3350_v50 }
  0x11   :  { %118 = vrot.lane.b32.xlu0 %v3407_v15, %s3344_s19  ;;  %120 = vrot.lane.b32.xlu1 %v3413_v16, %s3344_s19 }
  0x15   :  { %122 = vrot.lane.b32.xlu0 %v3415_v17, %s3344_s19  ;;  %124 = vrot.lane.b32.xlu1 %v3424_v19, %s3344_s19 }
  0x19   :  { %126 = vrot.lane.b32.xlu0 %v3426_v20, %s3344_s19  ;;  %128 = vrot.lane.b32.xlu1 %v3432_v21, %s3344_s19 }
  0x1d   :  { %130 = vrot.lane.b32.xlu0 %v3436_v23, %s3344_s19  ;;  %707 = vrot.lane.b32.xlu1 %v3393_v10, %s3345_s3 }
  0x21   :  { %709 = vrot.lane.b32.xlu0 %v3401_v13, %s3345_s3  ;;  %711 = vrot.lane.b32.xlu1 %v3395_v11, %s3345_s3 }
  0x25   :  { %713 = vrot.lane.b32.xlu0 %v3405_v14, %s3345_s3  ;;  %715 = vrot.lane.b32.xlu1 %v3407_v15, %s3345_s3 }
  0x29   :  { %717 = vrot.lane.b32.xlu0 %v3413_v16, %s3345_s3  ;;  %719 = vrot.lane.b32.xlu1 %v3415_v17, %s3345_s3 }
  0x2d   :  { %721 = vrot.lane.b32.xlu0 %v3424_v19, %s3345_s3  ;;  %723 = vrot.lane.b32.xlu1 %v3426_v20, %s3345_s3 }
  0x31   :  { %725 = vrot.lane.b32.xlu0 %v3432_v21, %s3345_s3  ;;  %727 = vrot.lane.b32.xlu1 %v3436_v23, %s3345_s3 }
  0x35   :  { %1032 = vrot.lane.b32.xlu0 %v3393_v10, %s3346_s22  ;;  %1034 = vrot.lane.b32.xlu1 %v3401_v13, %s3346_s22 }
  0x39   :  { %1036 = vrot.lane.b32.xlu0 %v3395_v11, %s3346_s22  ;;  %1038 = vrot.lane.b32.xlu1 %v3405_v14, %s3346_s22 }
  0x3d   :  { %1040 = vrot.lane.b32.xlu0 %v3407_v15, %s3346_s22  ;;  %1042 = vrot.lane.b32.xlu1 %v3413_v16, %s3346_s22 }
  0x41   :  { %1044 = vrot.lane.b32.xlu0 %v3415_v17, %s3346_s22  ;;  %1046 = vrot.lane.b32.xlu1 %v3424_v19, %s3346_s22 }
  0x45   :  { %1048 = vrot.lane.b32.xlu0 %v3426_v20, %s3346_s22  ;;  %1050 = vrot.lane.b32.xlu1 %v3432_v21, %s3346_s22 }
  0x49   :  { %1052 = vrot.lane.b32.xlu0 %v3436_v23, %s3346_s22  ;;  %1357 = vrot.lane.b32.xlu1 %v3393_v10, %s3347_s23 }
  0x4d   :  { %1359 = vrot.lane.b32.xlu0 %v3401_v13, %s3347_s23  ;;  %1361 = vrot.lane.b32.xlu1 %v3395_v11, %s3347_s23 }
  0x51   :  { %1363 = vrot.lane.b32.xlu0 %v3405_v14, %s3347_s23  ;;  %1365 = vrot.lane.b32.xlu1 %v3407_v15, %s3347_s23 }
  0x55   :  { %1367 = vrot.lane.b32.xlu0 %v3413_v16, %s3347_s23  ;;  %1369 = vrot.lane.b32.xlu1 %v3415_v17, %s3347_s23 }
  0x59   :  { %1371 = vrot.lane.b32.xlu0 %v3424_v19, %s3347_s23  ;;  %1373 = vrot.lane.b32.xlu1 %v3426_v20, %s3347_s23 }
  0x5d   :  { %1375 = vrot.lane.b32.xlu0 %v3432_v21, %s3347_s23  ;;  %1377 = vrot.lane.b32.xlu1 %v3436_v23, %s3347_s23 }
  0x61   :  { %1682 = vrot.lane.b32.xlu0 %v3393_v10, %s3348_s24  ;;  %1684 = vrot.lane.b32.xlu1 %v3401_v13, %s3348_s24 }
  0x65   :  { %1686 = vrot.lane.b32.xlu0 %v3395_v11, %s3348_s24  ;;  %1688 = vrot.lane.b32.xlu1 %v3405_v14, %s3348_s24 }
  0x69   :  { %1690 = vrot.lane.b32.xlu0 %v3407_v15, %s3348_s24  ;;  %1692 = vrot.lane.b32.xlu1 %v3413_v16, %s3348_s24 }
  0x6d   :  { %1694 = vrot.lane.b32.xlu0 %v3415_v17, %s3348_s24  ;;  %1696 = vrot.lane.b32.xlu1 %v3424_v19, %s3348_s24 }
  0x71   :  { %1698 = vrot.lane.b32.xlu0 %v3426_v20, %s3348_s24  ;;  %1700 = vrot.lane.b32.xlu1 %v3432_v21, %s3348_s24 }
  0x75   :  { %1702 = vrot.lane.b32.xlu0 %v3436_v23, %s3348_s24  ;;  %2008 = vrot.lane.b32.xlu1 %v3393_v10, %s3349_s25 }
  0x79   :  { %2010 = vrot.lane.b32.xlu0 %v3401_v13, %s3349_s25  ;;  %2012 = vrot.lane.b32.xlu1 %v3395_v11, %s3349_s25 }
  0x7b   :  { %v111_v24 = vpop.permute.xlu0 %110  ;;  %v115_v25 = vpop.permute.xlu1 %114 }
  0x7d   :  { %2014 = vrot.lane.b32.xlu0 %v3405_v14, %s3349_s25  ;;  %2016 = vrot.lane.b32.xlu1 %v3407_v15, %s3349_s25 }
  0x7f   :  { %v113_v26 = vpop.permute.xlu0 %112  ;;  %v117_v27 = vpop.permute.xlu1 %116 }
  0x80   :  { %v134_v28 = vsel %vm132_vm0, %v113_v26, %v115_v25  ;;  %v133_v29 = vsel %vm132_vm0, %v111_v24, %v113_v26  ;;  %v135_v32 = vsel %vm132_vm0, %v115_v25, %v117_v27 }
  0x81   :  { %3120 = vmatprep.subr.msk.bf16.mxu0 %vm147_vm1, %v134_v28  ;;  %v149_v30 = vsel %vm147_vm1, %v133_v29, 0  ;;  %2018 = vrot.lane.b32.xlu0 %v3413_v16, %s3349_s25  ;;  %v155_v36 = vsel %vm147_vm1, %v135_v32, 0 }
  0x82   :  { %182 = vmatpush1.bf16.msra.mxu0 %v149_v30  ;;  %2020 = vrot.lane.b32.xlu1 %v3415_v17, %s3349_s25 }
  0x83   :  { %v119_v33 = vpop.permute.xlu0 %118  ;;  %v121_v34 = vpop.permute.xlu1 %120 }
  0x84   :  { %v136_v35 = vsel %vm132_vm0, %v117_v27, %v119_v33  ;;  %v137_v37 = vsel %vm132_vm0, %v119_v33, %v121_v34 }
  0x85   :  { %3121 = vmatmul.mubr.msk.bf16.vlgmr.msra.gmra.mrb[0].mxu0 %vm143_vm2, %v3502_v31  ;;  %3122 = vmatprep.subr.msk.bf16.mxu1 %vm147_vm1, %v136_v35  ;;  %v161_v41 = vsel %vm147_vm1, %v137_v37, 0 }
  0x86   :  { %223 = vmatpush1.bf16.msra.mxu1 %v155_v36  ;;  %295 = vmatprep.mubr.bf16.mxu0 %v3343_v7 }
  0x87   :  { %v123_v38 = vpop.permute.xlu0 %122  ;;  %v125_v39 = vpop.permute.xlu1 %124  ;;  %2022 = vrot.lane.b32.xlu0 %v3424_v19, %s3349_s25  ;;  %2024 = vrot.lane.b32.xlu1 %v3426_v20, %s3349_s25 }
  0x88   :  { %v138_v40 = vsel %vm132_vm0, %v121_v34, %v123_v38  ;;  %v139_v42 = vsel %vm132_vm0, %v123_v38, %v125_v39 }
  0x89   :  { %3123 = vmatmul.mubr.msk.bf16.vlgmr.msra.gmra.mrb[0].mxu1 %vm143_vm2, %v3502_v31  ;;  %3124 = vmatprep.subr.msk.bf16.mxu0 %vm147_vm1, %v138_v40  ;;  %v167_v47 = vsel %vm147_vm1, %v139_v42, 0 }
  0x8a   :  { %264 = vmatpush1.bf16.msra.mxu0 %v161_v41  ;;  %335 = vmatprep.mubr.bf16.mxu1 %v3343_v7 }
  0x8b   :  { %v127_v43 = vpop.permute.xlu0 %126  ;;  %v129_v44 = vpop.permute.xlu1 %128  ;;  %2026 = vrot.lane.b32.xlu0 %v3432_v21, %s3349_s25  ;;  %2028 = vrot.lane.b32.xlu1 %v3436_v23, %s3349_s25 }
  0x8c   :  { %v140_v46 = vsel %vm132_vm0, %v125_v39, %v127_v43  ;;  %v141_v48 = vsel %vm132_vm0, %v127_v43, %v129_v44 }
  0x8d   :  { %3125 = vmatmul.mubr.msk.bf16.vlgmr.msra.gmra.mrb[4].mxu0 %vm143_vm2, %v3502_v31  ;;  %3126 = vmatprep.subr.msk.bf16.mxu1 %vm147_vm1, %v140_v46  ;;  %v173_v54 = vsel %vm147_vm1, %v141_v48, 0 }
  0x8e   :  { %304 = vmatpush1.bf16.msra.mxu1 %v167_v47  ;;  %376 = vmatprep.mubr.bf16.mxu0 %v3343_v7 }
  0x8f   :  { %v131_v49 = vpop.permute.xlu0 %130  ;;  %3244 = vmatprep.subr.bf16.mxu1 %v3350_v50  ;;  %v3541_v51 = vpop.permute.xlu1 %707  ;;  %2030 = vrot.lane.b32.xlu0 %v3531_v45, %s3349_s25 }
  0x90   :  { %v142_v52 = vsel %vm132_vm0, %v129_v44, %v131_v49  ;;  %v179_v53 = vsel %vm147_vm1, %v131_v49, 0  ;;  %2336 = vrot.lane.b32.xlu1 %v3393_v10, %s3351_s28 }
  0x91   :  { %3127 = vmatmul.mubr.msk.bf16.vlgmr.msra.gmra.mrb[4].mxu1 %vm143_vm2, %v3502_v31  ;;  %3128 = vmatprep.subr.msk.bf16.mxu0 %vm147_vm1, %v142_v52 }
  0x92   :  { %345 = vmatpush1.bf16.msra.mxu0 %v173_v54  ;;  %3245 = vmatpush3.bf16.msra.mxu1 %v179_v53 }
  0x93   :  { %3246 = vmatprep.mubr.msk.bf16.mxu1 %vm3352_vm3, %v3350_v50  ;;  %3131 = vmatprep.subr.msk.bf16.mxu0 %vm147_vm1, %v3401_v13  ;;  %v710_v56 = vpop.permute.xlu0 %709  ;;  %v3559_v57 = vpop.permute.xlu1 %711 }
  0x94   :  { %3133 = vmatprep.subr.msk.bf16.mxu1 %vm147_vm1, %v3405_v14  ;;  %2338 = vrot.lane.b32.xlu0 %v3401_v13, %s3351_s28  ;;  %v731_v9 = vsel %vm729_vm4, %v710_v56, %v3559_v57  ;;  %v730_v24 = vsel %vm729_vm4, %v3541_v51, %v710_v56 }
  0x95   :  { %3129 = vmatmul.mubr.msk.bf16.vlgmr.msra.gmra.mrb[8].mxu0 %vm143_vm2, %v3502_v31  ;;  %2340 = vrot.lane.b32.xlu1 %v3395_v11, %s3351_s28  ;;  %v744_v26 = vsel %vm147_vm1, %v730_v24, 0 }
  0x96   :  { %462 = vmatpush1.bf16.msra.mxu0 %v429_v55  ;;  %493 = vmatprep.mubr.bf16.mxu0 %v3343_v7  ;;  %v3154_v55 = vld [vmem:[%s4101_s0 + $0xc] sm:$0xf] }
  0x97   :  { %3135 = vmatprep.subr.msk.bf16.mxu0 %vm147_vm1, %v3413_v16  ;;  %v714_v59 = vpop.permute.xlu0 %713  ;;  %v3574_v60 = vpop.permute.xlu1 %715 }
  0x98   :  { %2342 = vrot.lane.b32.xlu0 %v3405_v14, %s3351_s28  ;;  %v733_v25 = vsel %vm729_vm4, %v714_v59, %v3574_v60  ;;  %v732_v29 = vsel %vm729_vm4, %v3559_v57, %v714_v59 }
  0x99   :  { %3247 = vmatmul.mubr.msk.bf16.vlgmr.msra.gmra.mrb[8].mxu1 %vm143_vm2, %v3502_v31  ;;  %2344 = vrot.lane.b32.xlu1 %v3407_v15, %s3351_s28 }
  0x9a   :  { %503 = vmatpush1.bf16.msra.mxu1 %v435_v58  ;;  %534 = vmatprep.mubr.bf16.mxu1 %v3343_v7 }
  0x9b   :  { %3137 = vmatprep.subr.msk.bf16.mxu1 %vm147_vm1, %v3424_v19  ;;  %v718_v63 = vpop.permute.xlu0 %717  ;;  %v3590_v0 = vpop.permute.xlu1 %719 }
  0x9c   :  { %2346 = vrot.lane.b32.xlu0 %v3413_v16, %s3351_s28  ;;  %v735_v30 = vsel %vm729_vm4, %v718_v63, %v3590_v0  ;;  %v734_v33 = vsel %vm729_vm4, %v3574_v60, %v718_v63 }
  0x9d   :  { %3132 = vmatmul.mubr.msk.bf16.vlgmr.msra.gmra.mrb[12].mxu0 %vm143_vm2, %v54_v61  ;;  %2348 = vrot.lane.b32.xlu1 %v3415_v17, %s3351_s28  ;;  %v756_v34 = vsel %vm147_vm1, %v734_v33, 0 }
  0x9e   :  { %544 = vmatpush1.bf16.msra.mxu0 %v441_v62  ;;  %575 = vmatprep.mubr.bf16.mxu0 %v3343_v7 }
  0x9f   :  { %3139 = vmatprep.subr.msk.bf16.mxu0 %vm147_vm1, %v3432_v21  ;;  %v722_v2 = vpop.permute.xlu0 %721  ;;  %v3602_v3 = vpop.permute.xlu1 %723 }
  0xa0   :  { %2350 = vrot.lane.b32.xlu0 %v3424_v19, %s3351_s28 }
  0xa1   :  { %3134 = vmatmul.mubr.msk.bf16.vlgmr.msra.gmra.mrb[12].mxu1 %vm143_vm2, %v54_v61  ;;  %2352 = vrot.lane.b32.xlu1 %v3426_v20, %s3351_s28 }
  0xa2   :  { %584 = vmatpush1.bf16.msra.mxu1 %v447_v1  ;;  %615 = vmatprep.mubr.bf16.mxu1 %v3343_v7 }
  0xa3   :  { %3250 = vmatprep.subr.bf16.mxu1 %v3350_v50  ;;  %v726_v6 = vpop.permute.xlu0 %725  ;;  %v3613_v8 = vpop.permute.xlu1 %727 }
  0xa4   :  { %2354 = vrot.lane.b32.xlu0 %v3432_v21, %s3351_s28  ;;  %v738_v40 = vsel %vm729_vm4, %v3602_v3, %v726_v6 }
  0xa5   :  { %3136 = vmatmul.mubr.msk.bf16.vlgmr.msra.gmra.mrb[16].mxu0 %vm143_vm2, %v54_v61  ;;  %2356 = vrot.lane.b32.xlu1 %v3436_v23, %s3351_s28 }
  0xa6   :  { %625 = vmatpush1.bf16.msra.mxu0 %v453_v5  ;;  %656 = vmatprep.mubr.bf16.mxu0 %v3343_v7 }
  0xa7   :  { %3143 = vmatprep.subr.msk.bf16.mxu0 %vm147_vm1, %v731_v9  ;;  %v3626_v18 = vpop.permute.xlu0 %1032  ;;  %v3628_v22 = vpop.permute.xlu1 %1034 }
  0xa8   :  { %2358 = vrot.lane.b32.xlu0 %v3531_v45, %s3351_s28 }
  0xa9   :  { %3138 = vmatmul.mubr.msk.bf16.vlgmr.msra.gmra.mrb[16].mxu1 %vm143_vm2, %v54_v61  ;;  %2664 = vrot.lane.b32.xlu1 %v3393_v10, %s3353_s5  ;;  %v750_v10 = vsel %vm147_vm1, %v732_v29, 0 }
  0xaa   :  { %3251 = vmatpush3.bf16.msra.mxu1 %v459_v12  ;;  %3252 = vmatprep.mubr.msk.bf16.mxu1 %vm3352_vm3, %v3350_v50 }
  0xab   :  { %3145 = vmatprep.subr.msk.bf16.mxu1 %vm147_vm1, %v733_v25  ;;  %v3643_v27 = vpop.permute.xlu0 %1036  ;;  %v3645_v28 = vpop.permute.xlu1 %1038 }
  0xac   :  { %2666 = vrot.lane.b32.xlu0 %v3401_v13, %s3353_s5  ;;  %v737_v13 = vsel %vm729_vm4, %v722_v2, %v3602_v3  ;;  %v1057_v48 = vsel %vm1054_vm5, %v3643_v27, %v3645_v28 }
  0xad   :  { %3140 = vmatmul.mubr.msk.bf16.vlgmr.msra.gmra.mrb[20].mxu0 %vm143_vm2, %v54_v61  ;;  %2668 = vrot.lane.b32.xlu1 %v3395_v11, %s3353_s5  ;;  %v3142_v11 = vld [vmem:[%s4101_s0 + $0x8] sm:$0xf]  ;;  %v1075_v49 = vsel %vm147_vm1, %v1057_v48, 0 }
  0xae   :  { %777 = vmatpush1.bf16.msra.mxu0 %v744_v26  ;;  %808 = vmatprep.mubr.bf16.mxu0 %v3343_v7 }
  0xaf   :  { %3147 = vmatprep.subr.msk.bf16.mxu0 %vm147_vm1, %v735_v30  ;;  %v3659_v31 = vpop.permute.xlu0 %1040  ;;  %v3661_v32 = vpop.permute.xlu1 %1042 }
  0xb0   :  { %2670 = vrot.lane.b32.xlu0 %v3405_v14, %s3353_s5  ;;  %v736_v14 = vsel %vm729_vm4, %v3590_v0, %v722_v2  ;;  %v1058_v44 = vsel %vm1054_vm5, %v3645_v28, %v3659_v31  ;;  %v1059_v53 = vsel %vm1054_vm5, %v3659_v31, %v3661_v32 }
  0xb1   :  { %3253 = vmatmul.mubr.msk.bf16.vlgmr.msra.gmra.mrb[20].mxu1 %vm143_vm2, %v54_v61  ;;  %2672 = vrot.lane.b32.xlu1 %v3407_v15, %s3353_s5  ;;  %v739_v15 = vsel %vm729_vm4, %v726_v6, %v3613_v8  ;;  %v762_v37 = vsel %vm147_vm1, %v736_v14, 0  ;;  %v1081_v56 = vsel %vm147_vm1, %v1059_v53, 0 }
  0xb2   :  { %818 = vmatpush1.bf16.msra.mxu1 %v750_v10  ;;  %849 = vmatprep.mubr.bf16.mxu1 %v3343_v7 }
  0xb3   :  { %3149 = vmatprep.subr.msk.bf16.mxu1 %vm147_vm1, %v737_v13  ;;  %v3678_v35 = vpop.permute.xlu0 %1044  ;;  %v3680_v36 = vpop.permute.xlu1 %1046 }
  0xb4   :  { %2674 = vrot.lane.b32.xlu0 %v3413_v16, %s3353_s5  ;;  %v768_v16 = vsel %vm147_vm1, %v738_v40, 0  ;;  %v1061_v59 = vsel %vm1054_vm5, %v3678_v35, %v3680_v36 }
  0xb5   :  { %3144 = vmatmul.mubr.msk.bf16.vlgmr.msra.gmra.mrb[24].mxu0 %vm143_vm2, %v3142_v11  ;;  %2676 = vrot.lane.b32.xlu1 %v3415_v17, %s3353_s5  ;;  %v1087_v61 = vsel %vm147_vm1, %v1061_v59, 0 }
  0xb6   :  { %859 = vmatpush1.bf16.msra.mxu0 %v756_v34  ;;  %890 = vmatprep.mubr.bf16.mxu0 %v3343_v7 }
  0xb7   :  { %3151 = vmatprep.subr.msk.bf16.mxu0 %vm147_vm1, %v739_v15  ;;  %v1049_v38 = vpop.permute.xlu0 %1048  ;;  %v1051_v39 = vpop.permute.xlu1 %1050 }
  0xb8   :  { %2678 = vrot.lane.b32.xlu0 %v3424_v19, %s3353_s5  ;;  %v1056_v19 = vsel %vm1054_vm5, %v3628_v22, %v3643_v27  ;;  %v1062_v54 = vsel %vm1054_vm5, %v3680_v36, %v1049_v38  ;;  %v1063_v0 = vsel %vm1054_vm5, %v1049_v38, %v1051_v39 }
  0xb9   :  { %3146 = vmatmul.mubr.msk.bf16.vlgmr.msra.gmra.mrb[24].mxu1 %vm143_vm2, %v3142_v11  ;;  %2680 = vrot.lane.b32.xlu1 %v3426_v20, %s3353_s5  ;;  %v774_v20 = vsel %vm147_vm1, %v3613_v8, 0  ;;  %v1093_v1 = vsel %vm147_vm1, %v1063_v0, 0 }
  0xba   :  { %899 = vmatpush1.bf16.msra.mxu1 %v762_v37  ;;  %930 = vmatprep.mubr.bf16.mxu1 %v3343_v7 }
  0xbb   :  { %3256 = vmatprep.subr.bf16.mxu1 %v3350_v50  ;;  %v3704_v17 = vpop.permute.xlu0 %1052  ;;  %v3706_v41 = vpop.permute.xlu1 %1357 }
  0xbc   :  { %2682 = vrot.lane.b32.xlu0 %v3432_v21, %s3353_s5  ;;  %v1055_v21 = vsel %vm1054_vm5, %v3626_v18, %v3628_v22  ;;  %v1064_v60 = vsel %vm1054_vm5, %v1051_v39, %v3704_v17  ;;  %v1099_v6 = vsel %vm147_vm1, %v3704_v17, 0 }
  0xbd   :  { %3148 = vmatmul.mubr.msk.bf16.vlgmr.msra.gmra.mrb[28].mxu0 %vm143_vm2, %v3142_v11  ;;  %2684 = vrot.lane.b32.xlu1 %v3436_v23, %s3353_s5  ;;  %v1069_v23 = vsel %vm147_vm1, %v1055_v21, 0 }
  0xbe   :  { %940 = vmatpush1.bf16.msra.mxu0 %v768_v16  ;;  %971 = vmatprep.mubr.bf16.mxu0 %v3343_v7 }
  0xbf   :  { %3155 = vmatprep.subr.msk.bf16.mxu0 %vm147_vm1, %v1056_v19  ;;  %v1360_v42 = vpop.permute.xlu0 %1359  ;;  %v3720_v43 = vpop.permute.xlu1 %1361 }
  0xc0   :  { %2686 = vrot.lane.b32.xlu0 %v3531_v45, %s3353_s5  ;;  %v1060_v45 = vsel %vm1054_vm5, %v3661_v32, %v3678_v35  ;;  %v1381_v5 = vsel %vm1379_vm6, %v1360_v42, %v3720_v43  ;;  %v1380_v12 = vsel %vm1379_vm6, %v3706_v41, %v1360_v42  ;;  %v3166_v32 = vld [vmem:[%s4101_s0 + $0x10] sm:$0xf] }
  0xc1   :  { %3150 = vmatmul.mubr.msk.bf16.vlgmr.msra.gmra.mrb[28].mxu1 %vm143_vm2, %v3142_v11  ;;  %v1394_v22 = vsel %vm147_vm1, %v1380_v12, 0 }
  0xc2   :  { %3257 = vmatpush3.bf16.msra.mxu1 %v774_v20  ;;  %3258 = vmatprep.mubr.msk.bf16.mxu1 %vm3352_vm3, %v3350_v50 }
  0xc3   :  { %3157 = vmatprep.subr.msk.bf16.mxu1 %vm147_vm1, %v1058_v44  ;;  %v1364_v46 = vpop.permute.xlu0 %1363  ;;  %v3735_v47 = vpop.permute.xlu1 %1365 }
  0xc4   :  { %v1383_v18 = vsel %vm1379_vm6, %v1364_v46, %v3735_v47  ;;  %v1382_v26 = vsel %vm1379_vm6, %v3720_v43, %v1364_v46 }
  0xc5   :  { %3152 = vmatmul.mubr.msk.bf16.vlgmr.msra.gmra.mrb[32].mxu0 %vm143_vm2, %v3142_v11  ;;  %v1400_v28 = vsel %vm147_vm1, %v1382_v26, 0 }
  0xc6   :  { %1102 = vmatpush1.bf16.msra.mxu0 %v1069_v23  ;;  %1133 = vmatprep.mubr.bf16.mxu0 %v3343_v7 }
  0xc7   :  { %3159 = vmatprep.subr.msk.bf16.mxu0 %vm147_vm1, %v1060_v45  ;;  %v1368_v51 = vpop.permute.xlu0 %1367  ;;  %v3747_v52 = vpop.permute.xlu1 %1369 }
  0xc8   :  { %v1385_v27 = vsel %vm1379_vm6, %v1368_v51, %v3747_v52  ;;  %v1384_v10 = vsel %vm1379_vm6, %v3735_v47, %v1368_v51 }
  0xc9   :  { %3259 = vmatmul.mubr.msk.bf16.vlgmr.msra.gmra.mrb[32].mxu1 %vm143_vm2, %v3142_v11  ;;  %v1406_v33 = vsel %vm147_vm1, %v1384_v10, 0 }
  0xca   :  { %1143 = vmatpush1.bf16.msra.mxu1 %v1075_v49  ;;  %1174 = vmatprep.mubr.bf16.mxu1 %v3343_v7 }
  0xcb   :  { %3161 = vmatprep.subr.msk.bf16.mxu1 %vm147_vm1, %v1062_v54  ;;  %v1372_v57 = vpop.permute.xlu0 %1371  ;;  %v3761_v58 = vpop.permute.xlu1 %1373 }
  0xcc   :  { %v1387_v31 = vsel %vm1379_vm6, %v1372_v57, %v3761_v58  ;;  %v1386_v34 = vsel %vm1379_vm6, %v3747_v52, %v1372_v57  ;;  %v3178_v52 = vld [vmem:[%s4101_s0 + $0x14] sm:$0xf] }
  0xcd   :  { %3156 = vmatmul.mubr.msk.bf16.vlgmr.msra.gmra.mrb[36].mxu0 %vm143_vm2, %v3154_v55  ;;  %v1412_v36 = vsel %vm147_vm1, %v1386_v34, 0 }
  0xce   :  { %1184 = vmatpush1.bf16.msra.mxu0 %v1081_v56  ;;  %1215 = vmatprep.mubr.bf16.mxu0 %v3343_v7 }
  0xcf   :  { %3163 = vmatprep.subr.msk.bf16.mxu0 %vm147_vm1, %v1064_v60  ;;  %v1376_v62 = vpop.permute.xlu0 %1375  ;;  %v3772_v63 = vpop.permute.xlu1 %1377 }
  0xd0   :  { %v1389_v35 = vsel %vm1379_vm6, %v1376_v62, %v3772_v63  ;;  %v1388_v37 = vsel %vm1379_vm6, %v3761_v58, %v1376_v62  ;;  %v1424_v17 = vsel %vm147_vm1, %v3772_v63, 0 }
  0xd1   :  { %3158 = vmatmul.mubr.msk.bf16.vlgmr.msra.gmra.mrb[36].mxu1 %vm143_vm2, %v3154_v55  ;;  %v1418_v38 = vsel %vm147_vm1, %v1388_v37, 0 }
  0xd2   :  { %1224 = vmatpush1.bf16.msra.mxu1 %v1087_v61  ;;  %1255 = vmatprep.mubr.bf16.mxu1 %v3343_v7 }
  0xd3   :  { %3262 = vmatprep.subr.bf16.mxu1 %v3350_v50  ;;  %v3779_v2 = vpop.permute.xlu0 %1682  ;;  %v3781_v3 = vpop.permute.xlu1 %1684 }
  0xd4   :  { %v1705_v20 = vsel %vm1704_vm7, %v3779_v2, %v3781_v3 }
  0xd5   :  { %3160 = vmatmul.mubr.msk.bf16.vlgmr.msra.gmra.mrb[40].mxu0 %vm143_vm2, %v3154_v55  ;;  %v1719_v43 = vsel %vm147_vm1, %v1705_v20, 0 }
  0xd6   :  { %1265 = vmatpush1.bf16.msra.mxu0 %v1093_v1  ;;  %1296 = vmatprep.mubr.bf16.mxu0 %v3343_v7 }
  0xd7   :  { %3167 = vmatprep.subr.msk.bf16.mxu0 %vm147_vm1, %v1381_v5  ;;  %v3790_v8 = vpop.permute.xlu0 %1686  ;;  %v3792_v9 = vpop.permute.xlu1 %1688 }
  0xd8   :  { %v1706_v16 = vsel %vm1704_vm7, %v3781_v3, %v3790_v8  ;;  %v1707_v44 = vsel %vm1704_vm7, %v3790_v8, %v3792_v9 }
  0xd9   :  { %3162 = vmatmul.mubr.msk.bf16.vlgmr.msra.gmra.mrb[40].mxu1 %vm143_vm2, %v3154_v55  ;;  %v1725_v47 = vsel %vm147_vm1, %v1707_v44, 0 }
  0xda   :  { %3263 = vmatpush3.bf16.msra.mxu1 %v1099_v6  ;;  %3264 = vmatprep.mubr.msk.bf16.mxu1 %vm3352_vm3, %v3350_v50 }
  0xdb   :  { %3169 = vmatprep.subr.msk.bf16.mxu1 %vm147_vm1, %v1383_v18  ;;  %v3803_v24 = vpop.permute.xlu0 %1690  ;;  %v3805_v25 = vpop.permute.xlu1 %1692 }
  0xdc   :  { %v1708_v42 = vsel %vm1704_vm7, %v3792_v9, %v3803_v24  ;;  %v1709_v48 = vsel %vm1704_vm7, %v3803_v24, %v3805_v25 }
  0xdd   :  { %3164 = vmatmul.mubr.msk.bf16.vlgmr.msra.gmra.mrb[44].mxu0 %vm143_vm2, %v3154_v55  ;;  %v1731_v53 = vsel %vm147_vm1, %v1709_v48, 0 }
  0xde   :  { %1427 = vmatpush1.bf16.msra.mxu0 %v1394_v22  ;;  %1458 = vmatprep.mubr.bf16.mxu0 %v3343_v7 }
  0xdf   :  { %3171 = vmatprep.subr.msk.bf16.mxu0 %vm147_vm1, %v1385_v27  ;;  %v3815_v29 = vpop.permute.xlu0 %1694  ;;  %v3817_v30 = vpop.permute.xlu1 %1696 }
  0xe0   :  { %v1710_v23 = vsel %vm1704_vm7, %v3805_v25, %v3815_v29  ;;  %v1711_v54 = vsel %vm1704_vm7, %v3815_v29, %v3817_v30 }
  0xe1   :  { %3265 = vmatmul.mubr.msk.bf16.vlgmr.msra.gmra.mrb[44].mxu1 %vm143_vm2, %v3154_v55  ;;  %v1737_v58 = vsel %vm147_vm1, %v1711_v54, 0 }
  0xe2   :  { %1468 = vmatpush1.bf16.msra.mxu1 %v1400_v28  ;;  %1499 = vmatprep.mubr.bf16.mxu1 %v3343_v7  ;;  %v3190_v28 = vld [vmem:[%s4101_s0 + $0x18] sm:$0xf] }
  0xe3   :  { %3173 = vmatprep.subr.msk.bf16.mxu1 %vm147_vm1, %v1387_v31  ;;  %v3830_v13 = vpop.permute.xlu0 %1698  ;;  %v3832_v11 = vpop.permute.xlu1 %1700 }
  0xe4   :  { %v1712_v45 = vsel %vm1704_vm7, %v3817_v30, %v3830_v13  ;;  %v1713_v59 = vsel %vm1704_vm7, %v3830_v13, %v3832_v11 }
  0xe5   :  { %3168 = vmatmul.mubr.msk.bf16.vlgmr.msra.gmra.mrb[48].mxu0 %vm143_vm2, %v3166_v32  ;;  %v1743_v62 = vsel %vm147_vm1, %v1713_v59, 0 }
  0xe6   :  { %1509 = vmatpush1.bf16.msra.mxu0 %v1406_v33  ;;  %1540 = vmatprep.mubr.bf16.mxu0 %v3343_v7 }
  0xe7   :  { %3175 = vmatprep.subr.msk.bf16.mxu0 %vm147_vm1, %v1389_v35  ;;  %v3842_v14 = vpop.permute.xlu0 %1702  ;;  %v3844_v15 = vpop.permute.xlu1 %2008 }
  0xe8   :  { %v1714_v55 = vsel %vm1704_vm7, %v3832_v11, %v3842_v14  ;;  %v1749_v1 = vsel %vm147_vm1, %v3842_v14, 0  ;;  %v2990_v11 = vld [vmem:[%s4102_s1] sm:$0xff] }
  0xe9   :  { %3170 = vmatmul.mubr.msk.bf16.vlgmr.msra.gmra.mrb[48].mxu1 %vm143_vm2, %v3166_v32  ;;  %2993 = vperm.xlu1 %3313, %v2990_v11  }
  0xea   :  { %1549 = vmatpush1.bf16.msra.mxu1 %v1412_v36  ;;  %1580 = vmatprep.mubr.bf16.mxu1 %v3343_v7 }
  0xeb   :  { %3268 = vmatprep.subr.bf16.mxu1 %v3350_v50  ;;  %v3852_v39 = vpop.permute.xlu0 %2010  ;;  %v3854_v40 = vpop.permute.xlu1 %2012 }
  0xec   :  { %v2034_v63 = vsel %vm2032_vm8, %v3852_v39, %v3854_v40  ;;  %v2033_v3 = vsel %vm2032_vm8, %v3844_v15, %v3852_v39 }
  0xed   :  { %3172 = vmatmul.mubr.msk.bf16.vlgmr.msra.gmra.mrb[52].mxu0 %vm143_vm2, %v3166_v32  ;;  %v2048_v6 = vsel %vm147_vm1, %v2033_v3, 0 }
  0xee   :  { %1590 = vmatpush1.bf16.msra.mxu0 %v1418_v38  ;;  %1621 = vmatprep.mubr.bf16.mxu0 %v3343_v7 }
  0xef   :  { %3179 = vmatprep.subr.msk.bf16.mxu0 %vm147_vm1, %v1706_v16  ;;  %v3864_v41 = vpop.permute.xlu0 %2014  ;;  %v3866_v19 = vpop.permute.xlu1 %2016 }
  0xf0   :  { %v2036_v5 = vsel %vm2032_vm8, %v3864_v41, %v3866_v19  ;;  %v2035_v12 = vsel %vm2032_vm8, %v3854_v40, %v3864_v41 }
  0xf1   :  { %3174 = vmatmul.mubr.msk.bf16.vlgmr.msra.gmra.mrb[52].mxu1 %vm143_vm2, %v3166_v32  ;;  %v2054_v22 = vsel %vm147_vm1, %v2035_v12, 0 }
  0xf2   :  { %3269 = vmatpush3.bf16.msra.mxu1 %v1424_v17  ;;  %3270 = vmatprep.mubr.msk.bf16.mxu1 %vm3352_vm3, %v3350_v50 }
  0xf3   :  { %3181 = vmatprep.subr.msk.bf16.mxu1 %vm147_vm1, %v1708_v42  ;;  %v2019_v21 = vpop.permute.xlu0 %2018 }
  0xf4   :  { %v3885_v46 = vpop.permute.xlu1 %2020  ;;  %v2037_v24 = vsel %vm2032_vm8, %v3866_v19, %v2019_v21 }
  0xf5   :  { %3176 = vmatmul.mubr.msk.bf16.vlgmr.msra.gmra.mrb[56].mxu0 %vm143_vm2, %v3166_v32  ;;  %v2038_v18 = vsel %vm2032_vm8, %v2019_v21, %v3885_v46  ;;  %v2060_v29 = vsel %vm147_vm1, %v2037_v24, 0 }
  0xf6   :  { %1752 = vmatpush1.bf16.msra.mxu0 %v1719_v43  ;;  %1783 = vmatprep.mubr.bf16.mxu0 %v3343_v7 }
  0xf7   :  { %3183 = vmatprep.subr.msk.bf16.mxu0 %vm147_vm1, %v1710_v23  ;;  %v3202_v23 = vld [vmem:[%s4101_s0 + $0x1c] sm:$0xf] }
  0xf9   :  { %3271 = vmatmul.mubr.msk.bf16.vlgmr.msra.gmra.mrb[56].mxu1 %vm143_vm2, %v3166_v32  ;;  %v2023_v49 = vpop.permute.xlu0 %2022  ;;  %v3898_v51 = vpop.permute.xlu1 %2024 }
  0xfa   :  { %1793 = vmatpush1.bf16.msra.mxu1 %v1725_v47  ;;  %1824 = vmatprep.mubr.bf16.mxu1 %v3343_v7  ;;  %v2040_v25 = vsel %vm2032_vm8, %v2023_v49, %v3898_v51  ;;  %v2039_v30 = vsel %vm2032_vm8, %v3885_v46, %v2023_v49 }
  0xfb   :  { %3185 = vmatprep.subr.msk.bf16.mxu1 %vm147_vm1, %v1712_v45  ;;  %v2066_v31 = vsel %vm147_vm1, %v2039_v30, 0 }
  0xfd   :  { %3180 = vmatmul.mubr.msk.bf16.vlgmr.msra.gmra.mrb[60].mxu0 %vm143_vm2, %v3178_v52  ;;  %v2027_v56 = vpop.permute.xlu0 %2026  ;;  %v3913_v57 = vpop.permute.xlu1 %2028 }
  0xfe   :  { %1834 = vmatpush1.bf16.msra.mxu0 %v1731_v53  ;;  %1865 = vmatprep.mubr.bf16.mxu0 %v3343_v7  ;;  %v2042_v10 = vsel %vm2032_vm8, %v2027_v56, %v3913_v57  ;;  %v2041_v13 = vsel %vm2032_vm8, %v3898_v51, %v2027_v56 }
  0xff   :  { %3187 = vmatprep.subr.msk.bf16.mxu0 %vm147_vm1, %v1714_v55  ;;  %v2072_v34 = vsel %vm147_vm1, %v2041_v13, 0 }
 0x101   :  { %3182 = vmatmul.mubr.msk.bf16.vlgmr.msra.gmra.mrb[60].mxu1 %vm143_vm2, %v3178_v52  ;;  %v2031_v60 = vpop.permute.xlu0 %2030 }
 0x102   :  { %1874 = vmatpush1.bf16.msra.mxu1 %v1737_v58  ;;  %1905 = vmatprep.mubr.bf16.mxu1 %v3343_v7  ;;  %v3923_v61 = vpop.permute.xlu1 %2336  ;;  %v2043_v35 = vsel %vm2032_vm8, %v3913_v57, %v2031_v60 }
 0x103   :  { %3274 = vmatprep.subr.bf16.mxu1 %v3350_v50  ;;  %v2078_v37 = vsel %vm147_vm1, %v2043_v35, 0 }
 0x105   :  { %3184 = vmatmul.mubr.msk.bf16.vlgmr.msra.gmra.mrb[64].mxu0 %vm143_vm2, %v3178_v52 }
 0x106   :  { %1915 = vmatpush1.bf16.msra.mxu0 %v1743_v62  ;;  %1946 = vmatprep.mubr.bf16.mxu0 %v3343_v7  ;;  %v2339_v0 = vpop.permute.xlu0 %2338 }
 0x107   :  { %3191 = vmatprep.subr.msk.bf16.mxu0 %vm147_vm1, %v2034_v63  ;;  %v3935_v2 = vpop.permute.xlu1 %2340  ;;  %v2361_v38 = vsel %vm2360_vm9, %v3923_v61, %v2339_v0 }
 0x108   :  { %v2362_v36 = vsel %vm2360_vm9, %v2339_v0, %v3935_v2  ;;  %v2376_v40 = vsel %vm147_vm1, %v2361_v38, 0 }
 0x109   :  { %3186 = vmatmul.mubr.msk.bf16.vlgmr.msra.gmra.mrb[64].mxu1 %vm143_vm2, %v3178_v52 }
 0x10a   :  { %3275 = vmatpush3.bf16.msra.mxu1 %v1749_v1  ;;  %3276 = vmatprep.mubr.msk.bf16.mxu1 %vm3352_vm3, %v3350_v50  ;;  %v2343_v8 = vpop.permute.xlu0 %2342 }
 0x10b   :  { %3193 = vmatprep.subr.msk.bf16.mxu1 %vm147_vm1, %v2036_v5  ;;  %v2345_v9 = vpop.permute.xlu1 %2344  ;;  %v2363_v41 = vsel %vm2360_vm9, %v3935_v2, %v2343_v8 }
 0x10c   :  { %v2364_v39 = vsel %vm2360_vm9, %v2343_v8, %v2345_v9  ;;  %v2382_v20 = vsel %vm147_vm1, %v2363_v41, 0 }
 0x10d   :  { %3188 = vmatmul.mubr.msk.bf16.vlgmr.msra.gmra.mrb[68].mxu0 %vm143_vm2, %v3178_v52 }
 0x10e   :  { %2081 = vmatpush1.bf16.msra.mxu0 %v2048_v6  ;;  %2112 = vmatprep.mubr.bf16.mxu0 %v3343_v7  ;;  %v2347_v26 = vpop.permute.xlu0 %2346 }
 0x10f   :  { %3195 = vmatprep.subr.msk.bf16.mxu0 %vm147_vm1, %v2038_v18  ;;  %v2349_v27 = vpop.permute.xlu1 %2348  ;;  %v2365_v42 = vsel %vm2360_vm9, %v2345_v9, %v2347_v26  ;;  %v3214_v9 = vld [vmem:[%s4101_s0 + $0x20] sm:$0xf] }
 0x110   :  { %v2366_v19 = vsel %vm2360_vm9, %v2347_v26, %v2349_v27  ;;  %v2388_v46 = vsel %vm147_vm1, %v2365_v42, 0 }
 0x111   :  { %3277 = vmatmul.mubr.msk.bf16.vlgmr.msra.gmra.mrb[68].mxu1 %vm143_vm2, %v3178_v52 }
 0x112   :  { %2122 = vmatpush1.bf16.msra.mxu1 %v2054_v22  ;;  %2153 = vmatprep.mubr.bf16.mxu1 %v3343_v7  ;;  %v2351_v32 = vpop.permute.xlu0 %2350 }
 0x113   :  { %3197 = vmatprep.subr.msk.bf16.mxu1 %vm147_vm1, %v2040_v25  ;;  %v2353_v33 = vpop.permute.xlu1 %2352  ;;  %v2367_v47 = vsel %vm2360_vm9, %v2349_v27, %v2351_v32 }
 0x114   :  { %v2368_v43 = vsel %vm2360_vm9, %v2351_v32, %v2353_v33  ;;  %v2394_v45 = vsel %vm147_vm1, %v2367_v47, 0 }
 0x115   :  { %3192 = vmatmul.mubr.msk.bf16.vlgmr.msra.gmra.mrb[72].mxu0 %vm143_vm2, %v3190_v28 }
 0x116   :  { %2163 = vmatpush1.bf16.msra.mxu0 %v2060_v29  ;;  %2194 = vmatprep.mubr.bf16.mxu0 %v3343_v7  ;;  %v2355_v14 = vpop.permute.xlu0 %2354 }
 0x117   :  { %3199 = vmatprep.subr.msk.bf16.mxu0 %vm147_vm1, %v2042_v10  ;;  %v2357_v15 = vpop.permute.xlu1 %2356  ;;  %v2369_v52 = vsel %vm2360_vm9, %v2353_v33, %v2355_v14 }
 0x118   :  { %v2370_v48 = vsel %vm2360_vm9, %v2355_v14, %v2357_v15  ;;  %v2400_v53 = vsel %vm147_vm1, %v2369_v52, 0 }
 0x119   :  { %3194 = vmatmul.mubr.msk.bf16.vlgmr.msra.gmra.mrb[72].mxu1 %vm143_vm2, %v3190_v28 }
 0x11a   :  { %2203 = vmatpush1.bf16.msra.mxu1 %v2066_v31  ;;  %2234 = vmatprep.mubr.bf16.mxu1 %v3343_v7  ;;  %v2359_v16 = vpop.permute.xlu0 %2358 }
 0x11b   :  { %3280 = vmatprep.subr.bf16.mxu1 %v3350_v50  ;;  %v2665_v17 = vpop.permute.xlu1 %2664  ;;  %v2371_v54 = vsel %vm2360_vm9, %v2357_v15, %v2359_v16 }
 0x11c   :  { %v2406_v58 = vsel %vm147_vm1, %v2371_v54, 0 }
 0x11d   :  { %3196 = vmatmul.mubr.msk.bf16.vlgmr.msra.gmra.mrb[76].mxu0 %vm143_vm2, %v3190_v28 }
 0x11e   :  { %2244 = vmatpush1.bf16.msra.mxu0 %v2072_v34  ;;  %2275 = vmatprep.mubr.bf16.mxu0 %v3343_v7  ;;  %v2667_v21 = vpop.permute.xlu0 %2666 }
 0x11f   :  { %3203 = vmatprep.subr.msk.bf16.mxu0 %vm147_vm1, %v2362_v36  ;;  %v2669_v44 = vpop.permute.xlu1 %2668  ;;  %v2689_v59 = vsel %vm2688_vm10, %v2665_v17, %v2667_v21 }
 0x120   :  { %v2690_v55 = vsel %vm2688_vm10, %v2667_v21, %v2669_v44  ;;  %v2704_v61 = vsel %vm147_vm1, %v2689_v59, 0 }
 0x121   :  { %3198 = vmatmul.mubr.msk.bf16.vlgmr.msra.gmra.mrb[76].mxu1 %vm143_vm2, %v3190_v28 }
 0x122   :  { %3281 = vmatpush3.bf16.msra.mxu1 %v2078_v37  ;;  %3282 = vmatprep.mubr.msk.bf16.mxu1 %vm3352_vm3, %v3350_v50  ;;  %v2671_v49 = vpop.permute.xlu0 %2670 }
 0x123   :  { %3205 = vmatprep.subr.msk.bf16.mxu1 %vm147_vm1, %v2364_v39  ;;  %v2673_v51 = vpop.permute.xlu1 %2672  ;;  %v2691_v0 = vsel %vm2688_vm10, %v2669_v44, %v2671_v49 }
 0x124   :  { %v2692_v60 = vsel %vm2688_vm10, %v2671_v49, %v2673_v51  ;;  %v2710_v2 = vsel %vm147_vm1, %v2691_v0, 0 }
 0x125   :  { %3200 = vmatmul.mubr.msk.bf16.vlgmr.msra.gmra.mrb[80].mxu0 %vm143_vm2, %v3190_v28 }
 0x126   :  { %2409 = vmatpush1.bf16.msra.mxu0 %v2376_v40  ;;  %2440 = vmatprep.mubr.bf16.mxu0 %v3343_v7  ;;  %v2675_v56 = vpop.permute.xlu0 %2674 }
 0x127   :  { %3207 = vmatprep.subr.msk.bf16.mxu0 %vm147_vm1, %v2366_v19  ;;  %v2677_v57 = vpop.permute.xlu1 %2676  ;;  %v2693_v3 = vsel %vm2688_vm10, %v2673_v51, %v2675_v56 }
 0x128   :  { %v2694_v1 = vsel %vm2688_vm10, %v2675_v56, %v2677_v57  ;;  %v2716_v12 = vsel %vm147_vm1, %v2693_v3, 0 }
 0x129   :  { %3283 = vmatmul.mubr.msk.bf16.vlgmr.msra.gmra.mrb[80].mxu1 %vm143_vm2, %v3190_v28 }
 0x12a   :  { %2450 = vmatpush1.bf16.msra.mxu1 %v2382_v20  ;;  %2481 = vmatprep.mubr.bf16.mxu1 %v3343_v7  ;;  %v2679_v62 = vpop.permute.xlu0 %2678 }
 0x12b   :  { %3209 = vmatprep.subr.msk.bf16.mxu1 %vm147_vm1, %v2368_v43  ;;  %v2681_v63 = vpop.permute.xlu1 %2680  ;;  %v2695_v18 = vsel %vm2688_vm10, %v2677_v57, %v2679_v62 }
 0x12c   :  { %v2696_v5 = vsel %vm2688_vm10, %v2679_v62, %v2681_v63  ;;  %v2722_v24 = vsel %vm147_vm1, %v2695_v18, 0 }
 0x12d   :  { %3204 = vmatmul.mubr.msk.bf16.vlgmr.msra.gmra.mrb[84].mxu0 %vm143_vm2, %v3202_v23 }
 0x12e   :  { %2491 = vmatpush1.bf16.msra.mxu0 %v2388_v46  ;;  %2522 = vmatprep.mubr.bf16.mxu0 %v3343_v7  ;;  %v2683_v6 = vpop.permute.xlu0 %2682 }
 0x12f   :  { %3211 = vmatprep.subr.msk.bf16.mxu0 %vm147_vm1, %v2370_v48  ;;  %v2685_v8 = vpop.permute.xlu1 %2684  ;;  %v2697_v25 = vsel %vm2688_vm10, %v2681_v63, %v2683_v6 }
 0x130   :  { %v2698_v22 = vsel %vm2688_vm10, %v2683_v6, %v2685_v8  ;;  %v2728_v27 = vsel %vm147_vm1, %v2697_v25, 0 }
 0x131   :  { %3206 = vmatmul.mubr.msk.bf16.vlgmr.msra.gmra.mrb[84].mxu1 %vm143_vm2, %v3202_v23 }
 0x132   :  { %2531 = vmatpush1.bf16.msra.mxu1 %v2394_v45  ;;  %2562 = vmatprep.mubr.bf16.mxu1 %v3343_v7  ;;  %v2687_v26 = vpop.permute.xlu0 %2686 }
 0x133   :  { %3286 = vmatprep.subr.bf16.mxu1 %v3350_v50  ;;  %v2699_v28 = vsel %vm2688_vm10, %v2685_v8, %v2687_v26 }
 0x134   :  { %v2734_v29 = vsel %vm147_vm1, %v2699_v28, 0 }
 0x135   :  { %3208 = vmatmul.mubr.msk.bf16.vlgmr.msra.gmra.mrb[88].mxu0 %vm143_vm2, %v3202_v23 }
 0x136   :  { %2572 = vmatpush1.bf16.msra.mxu0 %v2400_v53  ;;  %2603 = vmatprep.mubr.bf16.mxu0 %v3343_v7 }
 0x137   :  { %3215 = vmatprep.subr.msk.bf16.mxu0 %vm147_vm1, %v2690_v55 }
 0x139   :  { %3210 = vmatmul.mubr.msk.bf16.vlgmr.msra.gmra.mrb[88].mxu1 %vm143_vm2, %v3202_v23 }
 0x13a   :  { %3287 = vmatpush3.bf16.msra.mxu1 %v2406_v58  ;;  %3288 = vmatprep.mubr.msk.bf16.mxu1 %vm3352_vm3, %v3350_v50 }
 0x13b   :  { %3217 = vmatprep.subr.msk.bf16.mxu1 %vm147_vm1, %v2692_v60 }
 0x13d   :  { %3212 = vmatmul.mubr.msk.bf16.vlgmr.msra.gmra.mrb[92].mxu0 %vm143_vm2, %v3202_v23 }
 0x13e   :  { %2737 = vmatpush1.bf16.msra.mxu0 %v2704_v61  ;;  %2768 = vmatprep.mubr.bf16.mxu0 %v3343_v7 }
 0x13f   :  { %3219 = vmatprep.subr.msk.bf16.mxu0 %vm147_vm1, %v2694_v1 }
 0x141   :  { %3289 = vmatmul.mubr.msk.bf16.vlgmr.msra.gmra.mrb[92].mxu1 %vm143_vm2, %v3202_v23 }
 0x142   :  { %2778 = vmatpush1.bf16.msra.mxu1 %v2710_v2  ;;  %2809 = vmatprep.mubr.bf16.mxu1 %v3343_v7 }
 0x143   :  { %3221 = vmatprep.subr.msk.bf16.mxu1 %vm147_vm1, %v2696_v5 }
 0x145   :  { %3216 = vmatmul.mubr.msk.bf16.vlgmr.msra.gmra.mrb[96].mxu0 %vm143_vm2, %v3214_v9 }
 0x146   :  { %2819 = vmatpush1.bf16.msra.mxu0 %v2716_v12  ;;  %2850 = vmatprep.mubr.bf16.mxu0 %v3343_v7 }
 0x147   :  { %3223 = vmatprep.subr.msk.bf16.mxu0 %vm147_vm1, %v2698_v22 }
 0x149   :  { %3218 = vmatmul.mubr.msk.bf16.vlgmr.msra.gmra.mrb[96].mxu1 %vm143_vm2, %v3214_v9 }
 0x14a   :  { %2859 = vmatpush1.bf16.msra.mxu1 %v2722_v24  ;;  %2890 = vmatprep.mubr.bf16.mxu1 %v3343_v7 }
 0x14b   :  { %3292 = vmatprep.subr.bf16.mxu1 %v3350_v50 }
 0x14d   :  { %3220 = vmatmul.mubr.msk.bf16.vlgmr.msra.gmra.mrb[100].mxu0 %vm143_vm2, %v3214_v9 }
 0x14e   :  { %2900 = vmatpush1.bf16.msra.mxu0 %v2728_v27  ;;  %2931 = vmatprep.mubr.bf16.mxu0 %v3343_v7 }
 0x151   :  { %3222 = vmatmul.mubr.msk.bf16.vlgmr.msra.gmra.mrb[100].mxu1 %vm143_vm2, %v3214_v9 }
 0x152   :  { %3293 = vmatpush3.bf16.msra.mxu1 %v2734_v29  ;;  %3294 = vmatprep.mubr.msk.bf16.mxu1 %vm3352_vm3, %v3350_v50 }
 0x155   :  { %3224 = vmatmul.mubr.msk.bf16.vlgmr.msra.gmra.mrb[104].mxu0 %vm143_vm2, %v3214_v9 }
 0x158   :  { %v215_v30 = vpop.f32.mrb[0].mxu0 }
 0x159   :  { %3295 = vmatmul.mubr.msk.bf16.vlgmr.msra.gmra.mrb[104].mxu1 %vm143_vm2, %v3214_v9  ;;  %v217_v10 = vpop.f32.mrb[1].mxu0 }
 0x15a   :  { %v219_v31 = vpop.f32.mrb[2].mxu0 }
 0x15b   :  { %v220_v32 = vpop.f32.mrb[3].mxu0 }
 0x15c   :  { %v256_v33 = vpop.f32.mrb[0].mxu1 }
 0x15d   :  { %v258_v13 = vpop.f32.mrb[1].mxu1 }
 0x15e   :  { %v260_v11 = vpop.f32.mrb[2].mxu1 }
 0x15f   :  { %v261_v7 = vpop.f32.mrb[3].mxu1 }
 0x160   :  { %v297_v34 = vpop.f32.mrb[4].mxu0 }
 0x161   :  { %v299_v35 = vpop.f32.mrb[5].mxu0 }
 0x162   :  { %v300_v36 = vpop.f32.mrb[6].mxu0 }
 0x163   :  { %v301_v14 = vpop.f32.mrb[7].mxu0 }
 0x164   :  { %v337_v15 = vpop.f32.mrb[4].mxu1 }
 0x165   :  { %v339_v37 = vpop.f32.mrb[5].mxu1 }
 0x166   :  { %v341_v38 = vpop.f32.mrb[6].mxu1 }
 0x167   :  { %v342_v39 = vpop.f32.mrb[7].mxu1 }
 0x168   :  { %v378_v40 = vpop.f32.mrb[8].mxu0 }
 0x169   :  { %v380_v16 = vpop.f32.mrb[9].mxu0 }
 0x16a   :  { %v382_v17 = vpop.f32.mrb[10].mxu0 }
 0x16b   :  { %v383_v41 = vpop.f32.mrb[11].mxu0 }
 0x16c   :  { %v419_v19 = vpop.f32.mrb[8].mxu1 }
 0x16d   :  { %v3248_v20 = vpop.f32.mrb[9].mxu1 }
 0x16e   :  { %v422_v42 = vpop.f32.mrb[10].mxu1 }
 0x16f   :  { %v3249_v43 = vpop.f32.mrb[11].mxu1 }
 0x170   :  { %v495_v21 = vpop.f32.mrb[12].mxu0 }
 0x171   :  { %v496_v44 = vadd.f32 %v495_v21, %v215_v30  ;;  %v497_v23 = vpop.f32.mrb[13].mxu0 }
 0x172   :  { %v498_v46 = vadd.f32 %v497_v23, %v217_v10  ;;  %v499_v47 = vpop.f32.mrb[14].mxu0 }
 0x173   :  { %v500_v48 = vpop.f32.mrb[15].mxu0 }
 0x174   :  { %v536_v45 = vpop.f32.mrb[12].mxu1 }
 0x175   :  { %v537_v49 = vadd.f32 %v536_v45, %v256_v33  ;;  %v538_v51 = vpop.f32.mrb[13].mxu1 }
 0x176   :  { %v539_v52 = vadd.f32 %v538_v51, %v258_v13  ;;  %v540_v53 = vpop.f32.mrb[14].mxu1 }
 0x177   :  { %v541_v54 = vpop.f32.mrb[15].mxu1 }
 0x178   :  { %v577_v55 = vpop.f32.mrb[16].mxu0 }
 0x179   :  { %v578_v56 = vadd.f32 %v577_v55, %v297_v34  ;;  %v579_v57 = vpop.f32.mrb[17].mxu0 }
 0x17a   :  { %v580_v58 = vpop.f32.mrb[18].mxu0 }
 0x17b   :  { %v581_v59 = vpop.f32.mrb[19].mxu0 }
 0x17c   :  { %v617_v60 = vpop.f32.mrb[16].mxu1 }
 0x17d   :  { %v618_v61 = vadd.f32 %v617_v60, %v337_v15  ;;  %v619_v62 = vpop.f32.mrb[17].mxu1 }
 0x17e   :  { %v620_v63 = vadd.f32 %v619_v62, %v339_v37  ;;  %v621_v0 = vpop.f32.mrb[18].mxu1 }
 0x17f   :  { %v622_v1 = vpop.f32.mrb[19].mxu1 }
 0x180   :  { %v658_v2 = vpop.f32.mrb[20].mxu0 }
 0x181   :  { %v659_v3 = vadd.f32 %v658_v2, %v378_v40  ;;  %v660_v5 = vpop.f32.mrb[21].mxu0 }
 0x182   :  { %v661_v6 = vadd.f32 %v660_v5, %v380_v16  ;;  %v662_v8 = vpop.f32.mrb[22].mxu0 }
 0x183   :  { %v663_v9 = vpop.f32.mrb[23].mxu0 }
 0x184   :  { %v699_v12 = vpop.f32.mrb[20].mxu1 }
 0x185   :  { %v700_v18 = vadd.f32 %v699_v12, %v419_v19  ;;  %v3254_v22 = vpop.f32.mrb[21].mxu1 }
 0x186   :  { %v702_v24 = vpop.f32.mrb[22].mxu1 }
 0x187   :  { %v3255_v25 = vpop.f32.mrb[23].mxu1 }
 0x188   :  { %v810_v26 = vpop.f32.mrb[24].mxu0 }
 0x189   :  { %v1020_v27 = vadd.f32 %v810_v26, %v496_v44  ;;  %v812_v28 = vpop.f32.mrb[25].mxu0 }
 0x18a   :  { %v1021_v29 = vadd.f32 %v812_v28, %v498_v46  ;;  %v814_v30 = vpop.f32.mrb[26].mxu0 }
 0x18b   :  { %v815_v10 = vpop.f32.mrb[27].mxu0 }
 0x18c   :  { %v851_v31 = vpop.f32.mrb[24].mxu1 }
 0x18d   :  { %v1022_v32 = vadd.f32 %v851_v31, %v537_v49  ;;  %v853_v33 = vpop.f32.mrb[25].mxu1 }
 0x18e   :  { %v1023_v13 = vadd.f32 %v853_v33, %v539_v52  ;;  %v855_v11 = vpop.f32.mrb[26].mxu1 }
 0x18f   :  { %v856_v7 = vpop.f32.mrb[27].mxu1 }
 0x190   :  { %v892_v34 = vpop.f32.mrb[28].mxu0 }
 0x191   :  { %v1024_v35 = vadd.f32 %v892_v34, %v578_v56  ;;  %v894_v36 = vpop.f32.mrb[29].mxu0 }
 0x192   :  { %v895_v14 = vpop.f32.mrb[30].mxu0 }
 0x193   :  { %v896_v15 = vpop.f32.mrb[31].mxu0 }
 0x194   :  { %v932_v37 = vpop.f32.mrb[28].mxu1 }
 0x195   :  { %v1025_v38 = vadd.f32 %v932_v37, %v618_v61  ;;  %v934_v39 = vpop.f32.mrb[29].mxu1 }
 0x196   :  { %v1026_v40 = vadd.f32 %v934_v39, %v620_v63  ;;  %v936_v16 = vpop.f32.mrb[30].mxu1 }
 0x197   :  { %v937_v17 = vpop.f32.mrb[31].mxu1 }
 0x198   :  { %v973_v41 = vpop.f32.mrb[32].mxu0 }
 0x199   :  { %v1027_v19 = vadd.f32 %v973_v41, %v659_v3  ;;  %v975_v20 = vpop.f32.mrb[33].mxu0 }
 0x19a   :  { %v1028_v42 = vadd.f32 %v975_v20, %v661_v6  ;;  %v977_v43 = vpop.f32.mrb[34].mxu0 }
 0x19b   :  { %v978_v21 = vpop.f32.mrb[35].mxu0 }
 0x19c   :  { %v1014_v44 = vpop.f32.mrb[32].mxu1 }
 0x19d   :  { %v1029_v23 = vadd.f32 %v1014_v44, %v700_v18  ;;  %v3260_v46 = vpop.f32.mrb[33].mxu1 }
 0x19e   :  { %v1017_v47 = vpop.f32.mrb[34].mxu1 }
 0x19f   :  { %v3261_v48 = vpop.f32.mrb[35].mxu1 }
 0x1a0   :  { %v1135_v45 = vpop.f32.mrb[36].mxu0 }
 0x1a1   :  { %v1345_v49 = vadd.f32 %v1135_v45, %v1020_v27  ;;  %v1137_v51 = vpop.f32.mrb[37].mxu0 }
 0x1a2   :  { %v1346_v52 = vadd.f32 %v1137_v51, %v1021_v29  ;;  %v1139_v53 = vpop.f32.mrb[38].mxu0 }
 0x1a3   :  { %v1140_v54 = vpop.f32.mrb[39].mxu0 }
 0x1a4   :  { %v1176_v55 = vpop.f32.mrb[36].mxu1 }
 0x1a5   :  { %v1347_v56 = vadd.f32 %v1176_v55, %v1022_v32  ;;  %v1178_v57 = vpop.f32.mrb[37].mxu1 }
 0x1a6   :  { %v1348_v58 = vadd.f32 %v1178_v57, %v1023_v13  ;;  %v1180_v59 = vpop.f32.mrb[38].mxu1 }
 0x1a7   :  { %v1181_v60 = vpop.f32.mrb[39].mxu1 }
 0x1a8   :  { %v1217_v61 = vpop.f32.mrb[40].mxu0 }
 0x1a9   :  { %v1349_v62 = vadd.f32 %v1217_v61, %v1024_v35  ;;  %v1219_v63 = vpop.f32.mrb[41].mxu0 }
 0x1aa   :  { %v1220_v0 = vpop.f32.mrb[42].mxu0 }
 0x1ab   :  { %v1221_v1 = vpop.f32.mrb[43].mxu0 }
 0x1ac   :  { %v1257_v2 = vpop.f32.mrb[40].mxu1 }
 0x1ad   :  { %v1350_v3 = vadd.f32 %v1257_v2, %v1025_v38  ;;  %v1259_v5 = vpop.f32.mrb[41].mxu1 }
 0x1ae   :  { %v1351_v6 = vadd.f32 %v1259_v5, %v1026_v40  ;;  %v1261_v8 = vpop.f32.mrb[42].mxu1 }
 0x1af   :  { %v1262_v9 = vpop.f32.mrb[43].mxu1 }
 0x1b0   :  { %v1298_v12 = vpop.f32.mrb[44].mxu0 }
 0x1b1   :  { %v1352_v18 = vadd.f32 %v1298_v12, %v1027_v19  ;;  %v1300_v22 = vpop.f32.mrb[45].mxu0 }
 0x1b2   :  { %v1353_v24 = vadd.f32 %v1300_v22, %v1028_v42  ;;  %v1302_v25 = vpop.f32.mrb[46].mxu0 }
 0x1b3   :  { %v1303_v26 = vpop.f32.mrb[47].mxu0 }
 0x1b4   :  { %v1339_v27 = vpop.f32.mrb[44].mxu1 }
 0x1b5   :  { %v1354_v28 = vadd.f32 %v1339_v27, %v1029_v23  ;;  %v3266_v29 = vpop.f32.mrb[45].mxu1 }
 0x1b6   :  { %v1342_v30 = vpop.f32.mrb[46].mxu1 }
 0x1b7   :  { %v3267_v10 = vpop.f32.mrb[47].mxu1 }
 0x1b8   :  { %v1460_v31 = vpop.f32.mrb[48].mxu0 }
 0x1b9   :  { %v1670_v32 = vadd.f32 %v1460_v31, %v1345_v49  ;;  %v1462_v33 = vpop.f32.mrb[49].mxu0 }
 0x1ba   :  { %v1671_v13 = vadd.f32 %v1462_v33, %v1346_v52  ;;  %v1464_v11 = vpop.f32.mrb[50].mxu0 }
 0x1bb   :  { %v1465_v7 = vpop.f32.mrb[51].mxu0 }
 0x1bc   :  { %v1501_v34 = vpop.f32.mrb[48].mxu1 }
 0x1bd   :  { %v1672_v35 = vadd.f32 %v1501_v34, %v1347_v56  ;;  %v1503_v36 = vpop.f32.mrb[49].mxu1 }
 0x1be   :  { %v1673_v14 = vadd.f32 %v1503_v36, %v1348_v58  ;;  %v1505_v15 = vpop.f32.mrb[50].mxu1 }
 0x1bf   :  { %v1506_v37 = vpop.f32.mrb[51].mxu1 }
 0x1c0   :  { %v1542_v38 = vpop.f32.mrb[52].mxu0 }
 0x1c1   :  { %v1674_v39 = vadd.f32 %v1542_v38, %v1349_v62  ;;  %v1544_v40 = vpop.f32.mrb[53].mxu0 }
 0x1c2   :  { %v1545_v16 = vpop.f32.mrb[54].mxu0 }
 0x1c3   :  { %v1546_v17 = vpop.f32.mrb[55].mxu0 }
 0x1c4   :  { %v1582_v41 = vpop.f32.mrb[52].mxu1 }
 0x1c5   :  { %v1675_v19 = vadd.f32 %v1582_v41, %v1350_v3  ;;  %v1584_v20 = vpop.f32.mrb[53].mxu1 }
 0x1c6   :  { %v1676_v42 = vadd.f32 %v1584_v20, %v1351_v6  ;;  %v1586_v43 = vpop.f32.mrb[54].mxu1 }
 0x1c7   :  { %v1587_v21 = vpop.f32.mrb[55].mxu1 }
 0x1c8   :  { %v1623_v44 = vpop.f32.mrb[56].mxu0 }
 0x1c9   :  { %v1677_v23 = vadd.f32 %v1623_v44, %v1352_v18  ;;  %v1625_v46 = vpop.f32.mrb[57].mxu0 }
 0x1ca   :  { %v1678_v47 = vadd.f32 %v1625_v46, %v1353_v24  ;;  %v1627_v48 = vpop.f32.mrb[58].mxu0 }
 0x1cb   :  { %v1628_v45 = vpop.f32.mrb[59].mxu0 }
 0x1cc   :  { %v1664_v49 = vpop.f32.mrb[56].mxu1 }
 0x1cd   :  { %v1679_v51 = vadd.f32 %v1664_v49, %v1354_v28  ;;  %v3272_v52 = vpop.f32.mrb[57].mxu1 }
 0x1ce   :  { %v1667_v53 = vpop.f32.mrb[58].mxu1 }
 0x1cf   :  { %v3273_v54 = vpop.f32.mrb[59].mxu1 }
 0x1d0   :  { %v1785_v55 = vpop.f32.mrb[60].mxu0 }
 0x1d1   :  { %v1995_v56 = vadd.f32 %v1785_v55, %v1670_v32  ;;  %v1787_v57 = vpop.f32.mrb[61].mxu0 }
 0x1d2   :  { %v1996_v58 = vadd.f32 %v1787_v57, %v1671_v13  ;;  %v1789_v59 = vpop.f32.mrb[62].mxu0 }
 0x1d3   :  { %v1790_v60 = vpop.f32.mrb[63].mxu0 }
 0x1d4   :  { %v1826_v61 = vpop.f32.mrb[60].mxu1 }
 0x1d5   :  { %v1997_v62 = vadd.f32 %v1826_v61, %v1672_v35  ;;  %v1828_v63 = vpop.f32.mrb[61].mxu1 }
 0x1d6   :  { %v1998_v0 = vadd.f32 %v1828_v63, %v1673_v14  ;;  %v1830_v1 = vpop.f32.mrb[62].mxu1 }
 0x1d7   :  { %v1831_v2 = vpop.f32.mrb[63].mxu1 }
 0x1d8   :  { %v1867_v3 = vpop.f32.mrb[64].mxu0 }
 0x1d9   :  { %v1999_v5 = vadd.f32 %v1867_v3, %v1674_v39  ;;  %v1869_v6 = vpop.f32.mrb[65].mxu0 }
 0x1da   :  { %v1870_v8 = vpop.f32.mrb[66].mxu0 }
 0x1db   :  { %v1871_v9 = vpop.f32.mrb[67].mxu0 }
 0x1dc   :  { %v1907_v12 = vpop.f32.mrb[64].mxu1 }
 0x1dd   :  { %v2000_v18 = vadd.f32 %v1907_v12, %v1675_v19  ;;  %v1909_v22 = vpop.f32.mrb[65].mxu1 }
 0x1de   :  { %v2001_v24 = vadd.f32 %v1909_v22, %v1676_v42  ;;  %v1911_v25 = vpop.f32.mrb[66].mxu1 }
 0x1df   :  { %v1912_v26 = vpop.f32.mrb[67].mxu1 }
 0x1e0   :  { %v1948_v27 = vpop.f32.mrb[68].mxu0 }
 0x1e1   :  { %v2002_v28 = vadd.f32 %v1948_v27, %v1677_v23  ;;  %v1950_v29 = vpop.f32.mrb[69].mxu0 }
 0x1e2   :  { %v2003_v30 = vadd.f32 %v1950_v29, %v1678_v47  ;;  %v1952_v10 = vpop.f32.mrb[70].mxu0 }
 0x1e3   :  { %v1953_v31 = vpop.f32.mrb[71].mxu0 }
 0x1e4   :  { %v1989_v32 = vpop.f32.mrb[68].mxu1 }
 0x1e5   :  { %v2004_v33 = vadd.f32 %v1989_v32, %v1679_v51  ;;  %v3278_v13 = vpop.f32.mrb[69].mxu1 }
 0x1e6   :  { %v1992_v11 = vpop.f32.mrb[70].mxu1 }
 0x1e7   :  { %v3279_v7 = vpop.f32.mrb[71].mxu1 }
 0x1e8   :  { %v2114_v34 = vpop.f32.mrb[72].mxu0 }
 0x1e9   :  { %v2324_v35 = vadd.f32 %v2114_v34, %v1995_v56  ;;  %v2116_v36 = vpop.f32.mrb[73].mxu0 }
 0x1ea   :  { %v2325_v14 = vadd.f32 %v2116_v36, %v1996_v58  ;;  %v2118_v15 = vpop.f32.mrb[74].mxu0 }
 0x1eb   :  { %v2119_v37 = vpop.f32.mrb[75].mxu0 }
 0x1ec   :  { %v2155_v38 = vpop.f32.mrb[72].mxu1 }
 0x1ed   :  { %v2326_v39 = vadd.f32 %v2155_v38, %v1997_v62  ;;  %v2157_v40 = vpop.f32.mrb[73].mxu1 }
 0x1ee   :  { %v2327_v16 = vadd.f32 %v2157_v40, %v1998_v0  ;;  %v2159_v17 = vpop.f32.mrb[74].mxu1 }
 0x1ef   :  { %v2160_v41 = vpop.f32.mrb[75].mxu1 }
 0x1f0   :  { %v2196_v19 = vpop.f32.mrb[76].mxu0 }
 0x1f1   :  { %v2328_v20 = vadd.f32 %v2196_v19, %v1999_v5  ;;  %v2198_v42 = vpop.f32.mrb[77].mxu0 }
 0x1f2   :  { %v2199_v43 = vpop.f32.mrb[78].mxu0 }
 0x1f3   :  { %v2200_v21 = vpop.f32.mrb[79].mxu0 }
 0x1f4   :  { %v2236_v44 = vpop.f32.mrb[76].mxu1 }
 0x1f5   :  { %v2329_v23 = vadd.f32 %v2236_v44, %v2000_v18  ;;  %v2238_v46 = vpop.f32.mrb[77].mxu1 }
 0x1f6   :  { %v2330_v47 = vadd.f32 %v2238_v46, %v2001_v24  ;;  %v2240_v48 = vpop.f32.mrb[78].mxu1 }
 0x1f7   :  { %v2241_v45 = vpop.f32.mrb[79].mxu1  ;;  %v2994_v48 = vpop.permute.xlu1 %2993 }
 0x1f8   :  { %v2277_v49 = vpop.f32.mrb[80].mxu0 }
 0x1f9   :  { %v2331_v51 = vadd.f32 %v2277_v49, %v2002_v28  ;;  %v2279_v52 = vpop.f32.mrb[81].mxu0 }
 0x1fa   :  { %v2332_v53 = vadd.f32 %v2279_v52, %v2003_v30  ;;  %v2281_v54 = vpop.f32.mrb[82].mxu0  ;;  %v3025_v52 = vsub.s32 0, %v3383_v4 }
 0x1fb   :  { %v2282_v55 = vpop.f32.mrb[83].mxu0 }
 0x1fc   :  { %v2318_v56 = vpop.f32.mrb[80].mxu1 }
 0x1fd   :  { %v2333_v57 = vadd.f32 %v2318_v56, %v2004_v33  ;;  %v3284_v58 = vpop.f32.mrb[81].mxu1  ;;  %v3021_v56 = vld [vmem:[%s4103_s2] sm:$0x1f]  ;;  %s3354_s2 = smov [#allocation3]  }
 0x1fe   :  { %v2321_v59 = vpop.f32.mrb[82].mxu1  ;;  %s3105_s3 = sshll.u32 %s3354_s2, 4  ;;  %s3106_s3 = int_to_ptr.vmem [resolvable:$true] %s3105_s3 }
 0x1ff   :  { %v3285_v60 = vpop.f32.mrb[83].mxu1  ;;  %s3318_s23 = scalar_lea.vmem %s3106_s3, 16  ;;  %s3322_s24 = scalar_lea.vmem %s3106_s3, 32 }
 0x200   :  { %v2442_v61 = vpop.f32.mrb[84].mxu0  ;;  %p3319_p0 = scmp.ne.s32.totalorder %s3106_s3, %s3318_s23  ;;  %p3323_p1 = scmp.lt.s32.totalorder %s3106_s3, %s3106_s3 }
 0x201   :  { %v2652_v62 = vadd.f32 %v2442_v61, %v2324_v35  ;;  %v2444_v63 = vpop.f32.mrb[85].mxu0  ;;  %p3324_p2 = scmp.lt.s32.totalorder %s3322_s24, %s3318_s23 }
 0x202   :  { %v2653_v0 = vadd.f32 %v2444_v63, %v2325_v14  ;;  %v2446_v1 = vpop.f32.mrb[86].mxu0 }
 0x203   :  { %v2447_v2 = vpop.f32.mrb[87].mxu0  ;;  %v3026_v1 = vrot.slane %v3021_v56, %v3025_v52  ;;  %v3057_v52 = vld [vmem:[#allocation2 + $0x20] sm:$0xff]  ;;  %p3325_p3 = por %p3324_p2, %p3323_p1 }
 0x204   :  { %v2483_v3 = vpop.f32.mrb[84].mxu1 }
 0x205   :  { %v2654_v5 = vadd.f32 %v2483_v3, %v2326_v39  ;;  %v2485_v6 = vpop.f32.mrb[85].mxu1  ;;  %p3326_p4 = pnand %p3325_p3, %p3319_p0 }
 0x206   :  { %v2655_v8 = vadd.f32 %v2485_v6, %v2327_v16  ;;  %v2487_v9 = vpop.f32.mrb[86].mxu1 }
 0x207   :  { %v2488_v12 = vpop.f32.mrb[87].mxu1 }
 0x208   :  { %v2524_v18 = vpop.f32.mrb[88].mxu0 }
 0x209   :  { %v2656_v22 = vadd.f32 %v2524_v18, %v2328_v20  ;;  %v2526_v24 = vpop.f32.mrb[89].mxu0  ;;  %v3037_v18 = vsub.s32 3, %v3383_v4 }
 0x20a   :  { %v2527_v25 = vpop.f32.mrb[90].mxu0 }
 0x20b   :  { %v2528_v26 = vpop.f32.mrb[91].mxu0 }
 0x20c   :  { %v2564_v27 = vpop.f32.mrb[88].mxu1 }
 0x20d   :  { %v2657_v28 = vadd.f32 %v2564_v27, %v2329_v23  ;;  %v2566_v29 = vpop.f32.mrb[89].mxu1 }
 0x20e   :  { %v2658_v30 = vadd.f32 %v2566_v29, %v2330_v47  ;;  %v2568_v10 = vpop.f32.mrb[90].mxu1 }
 0x20f   :  { %v2569_v31 = vpop.f32.mrb[91].mxu1 }
 0x210   :  { %v2605_v32 = vpop.f32.mrb[92].mxu0 }
 0x211   :  { %v2659_v33 = vadd.f32 %v2605_v32, %v2331_v51  ;;  %v2607_v13 = vpop.f32.mrb[93].mxu0 }
 0x212   :  { %v2660_v11 = vadd.f32 %v2607_v13, %v2332_v53  ;;  %v2609_v7 = vpop.f32.mrb[94].mxu0  ;;  %v3029_v53 = vsub.s32 1, %v3383_v4 }
 0x213   :  { %v2610_v34 = vpop.f32.mrb[95].mxu0 }
 0x214   :  { %v2646_v35 = vpop.f32.mrb[92].mxu1  ;;  %v3030_v3 = vrot.slane %v3021_v56, %v3029_v53  ;;  %v3041_v34 = vsub.s32 4, %v3383_v4 }
 0x215   :  { %v2661_v36 = vadd.f32 %v2646_v35, %v2333_v57  ;;  %v3290_v14 = vpop.f32.mrb[93].mxu1 }
 0x216   :  { %v2649_v15 = vpop.f32.mrb[94].mxu1 }
 0x217   :  { %v3291_v37 = vpop.f32.mrb[95].mxu1 }
 0x218   :  { %v2770_v38 = vpop.f32.mrb[96].mxu0 }
 0x219   :  { %v2980_v39 = vadd.f32 %v2770_v38, %v2652_v62  ;;  %v2772_v40 = vpop.f32.mrb[97].mxu0  ;;  %v3033_v62 = vsub.s32 2, %v3383_v4 }
 0x21a   :  { %v2981_v16 = vadd.f32 %v2772_v40, %v2653_v0  ;;  %v2774_v17 = vpop.f32.mrb[98].mxu0 }
 0x21b   :  { %v2775_v41 = vpop.f32.mrb[99].mxu0  ;;  %v2996_v55 = vadd.f32 %v2994_v48, %v2980_v39 }
 0x21c   :  { %v2811_v19 = vpop.f32.mrb[96].mxu1  ;;  %v2997_v59 = vadd.f32 %v2994_v48, %v2981_v16 }
 0x21d   :  { %v2982_v20 = vadd.f32 %v2811_v19, %v2654_v5  ;;  %v2813_v42 = vpop.f32.mrb[97].mxu1  ;;  %v3001_v6 = vmax.f32 %v2996_v55, 0.0 }
 0x21e   :  { %v2983_v43 = vadd.f32 %v2813_v42, %v2655_v8  ;;  %v2815_v21 = vpop.f32.mrb[98].mxu1  ;;  %v3002_v24 = vmax.f32 %v2997_v59, 0.0 }
 0x21f   :  { %v2816_v44 = vpop.f32.mrb[99].mxu1  ;;  %v2998_v0 = vadd.f32 %v2994_v48, %v2982_v20  ;;  %v3042_v21 = vrot.slane %v3021_v56, %v3041_v34 }
 0x220   :  { %v2852_v23 = vpop.f32.mrb[100].mxu0 }
 0x221   :  { %v2984_v46 = vadd.f32 %v2852_v23, %v2656_v22  ;;  %v2854_v47 = vpop.f32.mrb[101].mxu0  ;;  %v2999_v22 = vadd.f32 %v2994_v48, %v2983_v43  ;;  %v3003_v31 = vmax.f32 %v2998_v0, 0.0 }
 0x222   :  { %v2855_v45 = vpop.f32.mrb[102].mxu0 }
 0x223   :  { %v2856_v49 = vpop.f32.mrb[103].mxu0  ;;  %v3000_v35 = vadd.f32 %v2994_v48, %v2984_v46  ;;  %v3004_v38 = vmax.f32 %v2999_v22, 0.0 }
 0x224   :  { %v2892_v51 = vpop.f32.mrb[100].mxu1 }
 0x225   :  { %v2985_v54 = vadd.f32 %v2892_v51, %v2657_v28  ;;  %v2894_v57 = vpop.f32.mrb[101].mxu1  ;;  %v3005_v44 = vmax.f32 %v3000_v35, 0.0 }
 0x226   :  { %v2986_v58 = vadd.f32 %v2894_v57, %v2658_v30  ;;  %v2896_v60 = vpop.f32.mrb[102].mxu1  ;;  %v3034_v30 = vrot.slane %v3021_v56, %v3033_v62 }
 0x227   :  { %v3006_v61 = vadd.f32 %v2994_v48, %v2985_v54  ;;  %v2897_v63 = vpop.f32.mrb[103].mxu1 }
 0x228   :  { %v3007_v2 = vadd.f32 %v2994_v48, %v2986_v58  ;;  %v2933_v5 = vpop.f32.mrb[104].mxu0 }
 0x229   :  { %v3011_v8 = vmax.f32 %v3006_v61, 0.0  ;;  %v2987_v9 = vadd.f32 %v2933_v5, %v2659_v33  ;;  %v2935_v12 = vpop.f32.mrb[105].mxu0 }
 0x22a   :  { %v3012_v25 = vmax.f32 %v3007_v2, 0.0  ;;  %v2988_v26 = vadd.f32 %v2935_v12, %v2660_v11  ;;  %v2937_v27 = vpop.f32.mrb[106].mxu0  ;;  %v3038_v11 = vrot.slane %v3021_v56, %v3037_v18 }
 0x22b   :  { %v3016_v28 = vsub.f32 %v3001_v6, %v3011_v8  ;;  %v3008_v29 = vadd.f32 %v2994_v48, %v2987_v9  ;;  %v2938_v10 = vpop.f32.mrb[107].mxu0 }
 0x22c   :  { %v3017_v32 = vsub.f32 %v3002_v24, %v3012_v25  ;;  %v3009_v13 = vadd.f32 %v2994_v48, %v2988_v26  ;;  %v2974_v7 = vpop.f32.mrb[104].mxu1 }
 0x22d   :  { %v3048_v33 = vmul.f32 %v3026_v1, %v3016_v28  ;;  %v3013_v14 = vmax.f32 %v3008_v29, 0.0  ;;  %v2989_v15 = vadd.f32 %v2974_v7, %v2661_v36  ;;  %v3296_v37 = vpop.f32.mrb[105].mxu1 }
 0x22e   :  { %v3049_v39 = vmul.f32 %v3030_v3, %v3017_v32  ;;  %v3014_v40 = vmax.f32 %v3009_v13, 0.0  ;;  %v2977_v16 = vpop.f32.mrb[106].mxu1 }
 0x22f   :  { %v3058_v17 = vmul.f32 %v3048_v33, %v3048_v33  ;;  %v3018_v41 = vsub.f32 %v3003_v31, %v3013_v14  ;;  %v3010_v19 = vadd.f32 %v2994_v48, %v2989_v15  ;;  %v3297_v20 = vpop.f32.mrb[107].mxu1 }
 0x230   :  { %v3059_v42 = vmul.f32 %v3049_v39, %v3049_v39  ;;  %v3019_v43 = vsub.f32 %v3004_v38, %v3014_v40 }
 0x231   :  { %v3050_v23 = vmul.f32 %v3034_v30, %v3018_v41  ;;  %v3015_v4 = vmax.f32 %v3010_v19, 0.0 }
 0x232   :  { %v3051_v46 = vmul.f32 %v3038_v11, %v3019_v43  ;;  %v3082_v49 = vadd.f32 %v3059_v42, %v3058_v17 }
 0x233   :  { %v3060_v47 = vmul.f32 %v3050_v23, %v3050_v23  ;;  %v3020_v45 = vsub.f32 %v3005_v44, %v3015_v4 }
 0x234   :  { %v3061_v36 = vmul.f32 %v3051_v46, %v3051_v46 }
 0x235   :  { %v3052_v51 = vmul.f32 %v3042_v21, %v3020_v45  ;;  %v3083_v54 = vadd.f32 %v3082_v49, %v3060_v47 }
 0x237   :  { %v3062_v53 = vmul.f32 %v3052_v51, %v3052_v51  ;;  %v3084_v57 = vadd.f32 %v3083_v54, %v3061_v36 }
 0x239   :  { %v3067_v55 = vadd.f32 %v3062_v53, %v3057_v52 }
 0x23b   :  { %3073 = vst.msk [vmem:[#allocation2 + $0x20] sm:$0xff] %vm47_vm11, %v3067_v55 }
 0x242   :  { %v3081_v48 = vld [vmem:[#allocation2 + $0x20] sm:$0xff] }
 0x243   :  { %v3085_v58 = vsel %vm47_vm11, %v3081_v48, 0.0 }
 0x244   :  { %v3086_v56 = vadd.f32 %v3085_v58, %v3084_v57 }
 0x246   :  { %3087 = vadd.xlane.f32.xlu0 %v3086_v56 }
 0x2d3   :  { %v3088_v59 = vpop.xlane.xlu0 %3087 }
 0x2d4   :  { %v3089_v60 = vrot.slane %v3088_v59, 4 }
 0x2d6   :  { %v3090_v61 = vadd.f32 %v3089_v60, %v3088_v59 }
 0x2d8   :  { %v3091_v62 = vrot.slane %v3090_v61, 2 }
 0x2da   :  { %v3092_v63 = vadd.f32 %v3091_v62, %v3090_v61 }
 0x2dc   :  { %v3093_v0 = vrot.slane %v3092_v63, 1 }
 0x2de   :  { %v3094_v1 = vadd.f32 %v3093_v0, %v3092_v63 }
 0x2e0   :  { %3298 = vpush %v3094_v1 }
 0x311   :  { %s3299_s22 = spop %3298 }
 0x312   :  { %v3096_v2 = vstv %s3299_s22 }
 0x313   :  { %3098 = vst.msk [vmem:[#allocation3] sm:$0x1] %vm49_vm12, %v3096_v2 }
 0x314   :  { %3329 = shalt.err (!%p3326_p4)
}
 0x315   :  { %s3330_s27 = scalar_lea.hbm %s4105_s4, 16 }
 0x316   :  { %p3331_p5 = scmp.ne.s32.totalorder %s4105_s4, %s3330_s27  ;;  %p3334_p6 = scmp.lt.u32.totalorder %s3330_s27, %s4105_s4 }
 0x318   :  { %p3336_p7 = pnand %p3334_p6, %p3331_p5 }
 0x31a   :  { %3339 = shalt.err (!%p3336_p7)
}
 0x31b   :  { %3108 = dma.vmem_to_hbm [thread:$0]  %s3106_s3, 16, %s4105_s4, [#allocation4]  }
 0x31c   :  { %3340 = dma.done.wait [#allocation4], 16  }
 0x31d   :  { %3341 = vsyncadd [#allocation4], 4294967280 }
 0x31e   :  { %3112 = vsyncpa [#allocation4], 1 }

</bundles_post_ra>
